<compile_context>
chip_gen: v6e
topology: v6e:2x2x1
jax: 0.10.0
libtpu: 0.0.40
codegen_flags: <defaults>
</compile_context>

<pallas_src>
import functools
import math

import jax
import jax.numpy as jnp
from jax import lax
from jax.experimental import pallas as pl
from jax.experimental.pallas import tpu as pltpu


_LANE = 128


def _compute_vmem_limit():
    try:
        cap = int(pltpu.get_tpu_info().vmem_capacity_bytes)
        return int(min(cap * 3 // 4, 96 * 1024 * 1024))
    except Exception:
        return 48 * 1024 * 1024


_VMEM_LIMIT = _compute_vmem_limit()


def _round_up(x, m):
    return ((x + m - 1) // m) * m


def _pick_tile(dim, candidates=(512, 256, 128)):
    """Largest candidate tile dividing `dim` (dim 128-aligned), else dim itself."""
    for c in candidates:
        if dim % c == 0:
            return c
    return dim


# ----------------------------------------------------------------------------
# Pallas kernel: tiled  sum_i(A_i @ W_i) + bias  with fused skip-add / ReLU / GLU
# Grid (M//tm, N//tn, K//tk); f32 accumulator(s) in VMEM scratch.
# ----------------------------------------------------------------------------
def _make_mm_kernel(act, n_pairs, fuse_add):
    n_extra = 1 if fuse_add else 0

    if act == "glu":
        # refs: a, [skip], w_val, w_gate, b_val, b_gate, o, acc_v, acc_g
        def kernel(*refs):
            a_ref = refs[0]
            skip_ref = refs[1] if fuse_add else None
            wv_ref, wg_ref, bv_ref, bg_ref, o_ref, acc_v, acc_g = refs[1 + n_extra:]

            @pl.when(pl.program_id(2) == 0)
            def _():
                acc_v[...] = jnp.zeros_like(acc_v)
                acc_g[...] = jnp.zeros_like(acc_g)

            a = a_ref[...]
            if fuse_add:
                a = a + skip_ref[...]                 # fused skip-connection add
            acc_v[...] += jnp.dot(a, wv_ref[...], preferred_element_type=jnp.float32)
            acc_g[...] += jnp.dot(a, wg_ref[...], preferred_element_type=jnp.float32)

            @pl.when(pl.program_id(2) == pl.num_programs(2) - 1)
            def _():
                v = acc_v[...] + bv_ref[...]
                g = acc_g[...] + bg_ref[...]
                o_ref[...] = (v * jax.nn.sigmoid(g)).astype(o_ref.dtype)

        return kernel

    # refs: a_0..a_{n-1}, [skip], w_0..w_{n-1}, b, o, acc
    def kernel(*refs):
        a_refs = refs[:n_pairs]
        skip_ref = refs[n_pairs] if fuse_add else None
        w_refs = refs[n_pairs + n_extra: 2 * n_pairs + n_extra]
        b_ref, o_ref, acc_ref = refs[2 * n_pairs + n_extra:]

        @pl.when(pl.program_id(2) == 0)
        def _():
            acc_ref[...] = jnp.zeros_like(acc_ref)

        a0 = a_refs[0][...]
        if fuse_add:
            a0 = a0 + skip_ref[...]
        acc = jnp.dot(a0, w_refs[0][...], preferred_element_type=jnp.float32)
        for i in range(1, n_pairs):
            acc = acc + jnp.dot(a_refs[i][...], w_refs[i][...],
                                preferred_element_type=jnp.float32)
        acc_ref[...] += acc

        @pl.when(pl.program_id(2) == pl.num_programs(2) - 1)
        def _():
            r = acc_ref[...] + b_ref[...]
            if act == "relu":
                r = jnp.maximum(r, 0.0)
            o_ref[...] = r.astype(o_ref.dtype)

    return kernel


def matmul_bias_act(a_list, w_list, b, act="none", skip=None,
                    out_dtype=jnp.bfloat16, compute_dtype=jnp.bfloat16):
    """Computes act( sum_i A_i @ W_i + b ) with optional `skip` added to A_0.

    A_i: (M, K), W_i: (K, N), b: (N,).  GLU returns (M, N//2), else (M, N).
    """
    if not isinstance(a_list, (list, tuple)):
        a_list, w_list = [a_list], [w_list]
    n_pairs = len(a_list)
    M, K = a_list[0].shape
    N = w_list[0].shape[1]
    b = b.astype(jnp.float32).reshape(1, N)

    Kpad = _round_up(K, _LANE)
    tk = _pick_tile(Kpad)
    Mpad = _round_up(M, _LANE) if M >= _LANE else _round_up(M, 8)
    tm = _pick_tile(Mpad)

    def prep_a(a):
        a = a.astype(compute_dtype)
        if (Mpad, Kpad) != (M, K):
            a = jnp.pad(a, ((0, Mpad - M), (0, Kpad - K)))
        return a

    a_ops = [prep_a(a) for a in a_list]
    skip_op = prep_a(skip) if skip is not None else None

    if act == "glu":
        assert n_pairs == 1, "GLU only used with a single (A, W) pair here"
        n_half = N // 2
        n_half_pad = _round_up(n_half, _LANE)
        tn = _pick_tile(n_half_pad)

        def prep_w(w):
            w = w.astype(compute_dtype)
            return jnp.pad(w, ((0, Kpad - K), (0, n_half_pad - w.shape[1])))

        w_ops = [prep_w(w_list[0][:, :n_half]), prep_w(w_list[0][:, n_half:])]
        b_ops = [jnp.pad(b[:, :n_half], ((0, 0), (0, n_half_pad - n_half))),
                 jnp.pad(b[:, n_half:], ((0, 0), (0, n_half_pad - n_half)))]
        n_grid = n_half_pad // tn
        n_out_pad = n_half_pad
        n_valid = n_half
        acc_cols = 2 * tn
        n_accs = 2
    else:
        Npad = _round_up(N, _LANE)
        tn = _pick_tile(Npad)

        def prep_w(w):
            w = w.astype(compute_dtype)
            if (Kpad, Npad) != (K, N):
                w = jnp.pad(w, ((0, Kpad - K), (0, Npad - N)))
            return w

        w_ops = [prep_w(w) for w in w_list]
        b_ops = [jnp.pad(b, ((0, 0), (0, Npad - N))) if Npad != N else b]
        n_grid = Npad // tn
        n_out_pad = Npad
        n_valid = N
        acc_cols = tn
        n_accs = 1

    # Cap the f32 accumulator tile (~4 MiB) for v7x VMEM headroom.
    while tm > 128 and tm * acc_cols * 4 > (4 << 20):
        tm //= 2

    in_specs, operands = [], []
    for a in a_ops:
        in_specs.append(pl.BlockSpec((tm, tk), lambda i, j, k: (i, k)))
        operands.append(a)
    if skip_op is not None:
        in_specs.append(pl.BlockSpec((tm, tk), lambda i, j, k: (i, k)))
        operands.append(skip_op)
    for w in w_ops:
        in_specs.append(pl.BlockSpec((tk, tn), lambda i, j, k: (k, j)))
        operands.append(w)
    for bb in b_ops:
        in_specs.append(pl.BlockSpec((1, tn), lambda i, j, k: (0, j)))
        operands.append(bb)

    out_itemsize = jnp.dtype(out_dtype).itemsize
    flops = 2 * Mpad * Kpad * acc_cols * n_grid * (n_pairs if act != "glu" else 1)
    trans = Mpad * n_out_pad if act == "glu" else 0
    bytes_accessed = sum(int(x.size) * x.dtype.itemsize for x in operands)
    bytes_accessed += Mpad * n_out_pad * out_itemsize

    out = pl.pallas_call(
        _make_mm_kernel(act, n_pairs, skip_op is not None),
        out_shape=jax.ShapeDtypeStruct((Mpad, n_out_pad), out_dtype),
        grid=(Mpad // tm, n_grid, Kpad // tk),
        in_specs=in_specs,
        out_specs=pl.BlockSpec((tm, tn), lambda i, j, k: (i, j)),
        scratch_shapes=[pltpu.VMEM((tm, tn), jnp.float32) for _ in range(n_accs)],
        compiler_params=pltpu.CompilerParams(
            dimension_semantics=("parallel", "parallel", "arbitrary"),
            vmem_limit_bytes=_VMEM_LIMIT),
        cost_estimate=pl.CostEstimate(flops=int(flops), transcendentals=int(trans),
                                      bytes_accessed=int(bytes_accessed)),
    )(*operands)
    return out[:M, :n_valid]


# ----------------------------------------------------------------------------
# Pallas kernel: single-layer LSTM recurrence (input projection pre-computed).
# gx: (T, B, 4H) bf16 precomputed x@Wih + b; only h@Whh + gates run per step.
# Grid over time chunks; h/c persist in VMEM scratch across grid steps.
# ----------------------------------------------------------------------------
def _lstm_step_kernel(gx_ref, whh_ref, o_ref, h_sc, c_sc, *, hidden):
    @pl.when(pl.program_id(0) == 0)
    def _():
        h_sc[...] = jnp.zeros_like(h_sc)
        c_sc[...] = jnp.zeros_like(c_sc)

    H = hidden
    whh = whh_ref[...]                     # (Hp, 4*Hp) bf16
    tc = gx_ref.shape[0]

    def step(t, carry):
        h, c = carry
        gates = gx_ref[t].astype(jnp.float32) + jnp.dot(
            h.astype(jnp.bfloat16), whh, preferred_element_type=jnp.float32)
        i_g = jax.nn.sigmoid(gates[:, 0:H])
        f_g = jax.nn.sigmoid(gates[:, H:2 * H])
        g_g = jnp.tanh(gates[:, 2 * H:3 * H])
        o_g = jax.nn.sigmoid(gates[:, 3 * H:4 * H])
        c = f_g * c + i_g * g_g
        h = o_g * jnp.tanh(c)
        o_ref[t] = h
        return (h, c)

    h, c = lax.fori_loop(0, tc, step, (h_sc[...], c_sc[...]))
    h_sc[...] = h
    c_sc[...] = c


def _lstm_recurrence(gx, whh, hidden_pad):
    T, B, G = gx.shape
    tc = min(T, 128)
    Tpad = _round_up(T, tc)
    if Tpad != T:
        gx = jnp.pad(gx, ((0, Tpad - T), (0, 0), (0, 0)))
    out = pl.pallas_call(
        functools.partial(_lstm_step_kernel, hidden=hidden_pad),
        out_shape=jax.ShapeDtypeStruct((Tpad, B, hidden_pad), jnp.float32),
        grid=(Tpad // tc,),
        in_specs=[
            pl.BlockSpec((tc, B, G), lambda t: (t, 0, 0)),
            pl.BlockSpec((hidden_pad, G), lambda t: (0, 0)),
        ],
        out_specs=pl.BlockSpec((tc, B, hidden_pad), lambda t: (t, 0, 0)),
        scratch_shapes=[pltpu.VMEM((B, hidden_pad), jnp.float32),
                        pltpu.VMEM((B, hidden_pad), jnp.float32)],
        compiler_params=pltpu.CompilerParams(
            dimension_semantics=("arbitrary",),
            vmem_limit_bytes=_VMEM_LIMIT),
    )(gx, whh)
    return out[:T]


def lstm_forward(x_tbc, lstm):
    """x_tbc: (T, B, C) with C == LSTM dim.  Returns (T, B, C) f32."""
    T, B, C = x_tbc.shape
    Hp = lstm["wih"][0].shape[0]           # padded hidden (static int from shape)
    h = x_tbc.astype(jnp.float32)
    if C < Hp:
        h = jnp.pad(h, ((0, 0), (0, 0), (0, Hp - C)))
    for wih, whh, bias in zip(lstm["wih"], lstm["whh"], lstm["bias"]):
        # Time-parallel input projection -> one big tiled MXU matmul, bf16 out.
        gx = matmul_bias_act(h.reshape(T * B, Hp), wih, bias,
                             act="none", out_dtype=jnp.bfloat16)
        gx = gx.reshape(T, B, 4 * Hp)
        # Serial recurrence (f32 state / gate math, bf16 recurrent weight).
        h = _lstm_recurrence(gx, whh.astype(jnp.bfloat16), Hp)
    return h[:, :, :C]


# ----------------------------------------------------------------------------
# Conv wrappers (channels-last (B, T, C) layout throughout)
# ----------------------------------------------------------------------------
def conv1d_btc(x, weight, bias, stride, act="none", skip=None,
               out_dtype=jnp.bfloat16):
    """x: (B, T, Cin); weight: (Cout, Cin, K).  Returns (B, T_out, Cout[/2])."""
    B, T, Cin = x.shape
    Cout, _, Kk = weight.shape
    if Kk == 1 and stride == 1:
        a = x.reshape(B * T, Cin)
        sk = skip.reshape(B * T, Cin) if skip is not None else None
        w2d = weight.reshape(Cout, Cin).T
        y = matmul_bias_act(a, w2d, bias, act=act, skip=sk, out_dtype=out_dtype)
        return y.reshape(B, T, y.shape[-1])

    assert skip is None
    T_out = (T - Kk) // stride + 1
    w2d = weight.transpose(2, 1, 0).reshape(Kk * Cin, Cout)
    if Kk % stride == 0 and T % stride == 0:
        # Frame trick: no im2col materialization; K//stride shifted frame views
        # become multiple (A, W) pairs accumulated inside one matmul kernel.
        q = Kk // stride
        frames = x.reshape(B, T // stride, stride * Cin)
        a_list = [frames[:, j:j + T_out].reshape(B * T_out, stride * Cin)
                  for j in range(q)]
        w_list = [w2d[j * stride * Cin:(j + 1) * stride * Cin] for j in range(q)]
        y = matmul_bias_act(a_list, w_list, bias, act=act, out_dtype=out_dtype)
    else:
        # TODO(synk): fallback for K % stride != 0 materializes an im2col tensor.
        idx = jnp.arange(T_out)[:, None] * stride + jnp.arange(Kk)[None, :]
        a = x[:, idx, :].reshape(B * T_out, Kk * Cin)
        y = matmul_bias_act(a, w2d, bias, act=act, out_dtype=out_dtype)
    return y.reshape(B, T_out, y.shape[-1])


def conv_transpose1d_btc(x, weight, bias, stride, relu=False,
                         out_dtype=jnp.bfloat16):
    """x: (B, T, Cin); weight: (Cin, Cout, K).  Returns (B, (T-1)*stride+K, Cout)."""
    B, T, Cin = x.shape
    _, Cout, Kk = weight.shape
    T_out = (T - 1) * stride + Kk
    w2d = weight.transpose(0, 2, 1).reshape(Cin, Kk * Cout)   # columns (k, cout)

    if Kk % stride == 0:
        # out_frame[f] = sum_j x[f-j] @ W_j  -> overlap-add, bias and ReLU are
        # all fused in the matmul kernel's accumulate/finalize; bf16 output.
        q = Kk // stride
        Fo = T + q - 1
        a_list, w_list = [], []
        for j in range(q):
            xp = jnp.pad(x, ((0, 0), (j, q - 1 - j), (0, 0)))
            a_list.append(xp.reshape(B * Fo, Cin))
            w_list.append(w2d[:, j * stride * Cout:(j + 1) * stride * Cout])
        b_ext = jnp.tile(bias.astype(jnp.float32), stride)
        y = matmul_bias_act(a_list, w_list, b_ext,
                            act=("relu" if relu else "none"), out_dtype=out_dtype)
        out = y.reshape(B, Fo, stride, Cout).reshape(B, Fo * stride, Cout)
        return out[:, :T_out]

    # TODO(synk): generic K % stride != 0 path falls back to K strided scatters.
    y = matmul_bias_act(x.reshape(B * T, Cin), w2d,
                        jnp.zeros((Kk * Cout,), jnp.float32),
                        act="none", out_dtype=jnp.float32)
    y = y.reshape(B, T, Kk, Cout)
    out = jnp.zeros((B, T_out, Cout), jnp.float32)
    for k in range(Kk):
        out = out.at[:, k:k + (T - 1) * stride + 1:stride, :].add(y[:, :, k, :])
    out = out + bias[None, None, :].astype(jnp.float32)
    if relu:
        out = jnp.maximum(out, 0.0)
    return out.astype(out_dtype)


# ----------------------------------------------------------------------------
# Demucs parameters (deterministic init + rescale_module semantics).
# NOTE: params contain ONLY arrays (jit-safe pytree); static metadata lives in cfg.
# ----------------------------------------------------------------------------
def init_demucs_params(key, cfg):
    chin, chout, hidden = cfg["chin"], cfg["chout"], cfg["hidden"]
    depth, K = cfg["depth"], cfg["kernel_size"]
    growth, max_hidden = cfg["growth"], cfg["max_hidden"]
    ch_scale = 2 if cfg["glu"] else 1
    reference = cfg["rescale"]

    def uniform(k, shape, bound):
        return jax.random.uniform(k, shape, jnp.float32, -bound, bound)

    def conv_init(k, cout, cin, ksize):
        k1, k2 = jax.random.split(k)
        bound = 1.0 / math.sqrt(cin * ksize)
        return uniform(k1, (cout, cin, ksize), bound), uniform(k2, (cout,), bound)

    def convT_init(k, cin, cout, ksize):
        k1, k2 = jax.random.split(k)
        bound = 1.0 / math.sqrt(cout * ksize)
        return uniform(k1, (cin, cout, ksize), bound), uniform(k2, (cout,), bound)

    def rescale_wb(w, b):
        if not reference:
            return w, b
        std = jnp.std(w, ddof=1)                 # torch unbiased std
        scale = jnp.sqrt(std / reference)
        return w / scale, b / scale

    encoder, decoder = [], []
    for _ in range(depth):
        key, k1, k2, k3, k4 = jax.random.split(key, 5)
        w1, b1 = rescale_wb(*conv_init(k1, hidden, chin, K))
        w2, b2 = rescale_wb(*conv_init(k2, hidden * ch_scale, hidden, 1))
        encoder.append(dict(w1=w1, b1=b1, w2=w2, b2=b2))
        dw1, db1 = rescale_wb(*conv_init(k3, ch_scale * hidden, hidden, 1))
        dwt, dbt = rescale_wb(*convT_init(k4, hidden, chout, K))
        decoder.insert(0, dict(w1=dw1, b1=db1, wt=dwt, bt=dbt))
        chout = hidden
        chin = hidden
        hidden = min(int(growth * hidden), max_hidden)

    # causal=True -> unidirectional 2-layer LSTM(dim=chin), no linear head.
    # Gate blocks zero-padded to Hp (multiple of 128) so slices are lane-aligned;
    # zero padding is exactly neutral for LSTM math.
    dim, L = chin, 2
    Hp = _round_up(dim, _LANE)
    bound = 1.0 / math.sqrt(dim)
    wih_l, whh_l, bias_l = [], [], []
    for _ in range(L):
        key, ka, kb, kc, kd = jax.random.split(key, 5)
        wih = uniform(ka, (4 * dim, dim), bound)     # PyTorch (4H, H), gates i,f,g,o
        whh = uniform(kb, (4 * dim, dim), bound)
        bih = uniform(kc, (4 * dim,), bound)
        bhh = uniform(kd, (4 * dim,), bound)

        def pad_gate_mat(w):
            w4 = w.reshape(4, dim, dim)
            w4 = jnp.pad(w4, ((0, 0), (0, Hp - dim), (0, Hp - dim)))
            return w4.reshape(4 * Hp, Hp).T          # (Hp, 4*Hp)

        def pad_gate_vec(v):
            v4 = v.reshape(4, dim)
            v4 = jnp.pad(v4, ((0, 0), (0, Hp - dim)))
            return v4.reshape(4 * Hp)

        wih_l.append(pad_gate_mat(wih))
        whh_l.append(pad_gate_mat(whh))
        bias_l.append(pad_gate_vec(bih + bhh))
    lstm = dict(wih=wih_l, whh=whh_l, bias=bias_l)
    return dict(encoder=encoder, decoder=decoder, lstm=lstm)


def valid_length(length, cfg):
    resample, depth = cfg["resample"], cfg["depth"]
    K, S = cfg["kernel_size"], cfg["stride"]
    length = math.ceil(length * resample)
    for _ in range(depth):
        length = math.ceil((length - K) / S) + 1
        length = max(length, 1)
    for _ in range(depth):
        length = (length - 1) * S + K
    length = int(math.ceil(length / resample))
    return int(length)


# ----------------------------------------------------------------------------
# Demucs forward
# ----------------------------------------------------------------------------
def demucs_forward(params, mix, cfg):
    if mix.ndim == 2:
        mix = mix[:, None, :]
    _, _, length = mix.shape

    if cfg["normalize"]:
        mono = mix.mean(axis=1, keepdims=True)
        std = jnp.std(mono, axis=-1, keepdims=True, ddof=1)   # torch unbiased std
        mix = mix / (cfg["floor"] + std)
    else:
        std = 1.0

    x = jnp.pad(mix, ((0, 0), (0, 0), (0, valid_length(length, cfg) - length)))

    if cfg["resample"] != 1:
        # TODO(synk): upsample2/downsample2 sinc resamplers are external to the
        # given source; this implementation supports the resample=1 ctor option.
        raise NotImplementedError("resample != 1 not implemented")

    # NCT -> channels-last (B, T, C) once; stays channels-last end-to-end.
    x = x.transpose(0, 2, 1)

    act2 = "glu" if cfg["glu"] else "relu"
    skips = []
    for enc in params["encoder"]:
        x = conv1d_btc(x, enc["w1"], enc["b1"], stride=cfg["stride"], act="relu")
        x = conv1d_btc(x, enc["w2"], enc["b2"], stride=1, act=act2)
        skips.append(x)

    # (B, T, C) -> (T, B, C) for the time-major recurrence, and back.
    y = lstm_forward(x.transpose(1, 0, 2), params["lstm"])
    x = y.transpose(1, 0, 2)

    depth = len(params["decoder"])
    for li, dec in enumerate(params["decoder"]):
        skip = skips.pop(-1)[:, :x.shape[1], :]
        # skip-connection add fused into the 1x1 conv's matmul kernel
        x = conv1d_btc(x, dec["w1"], dec["b1"], stride=1, act=act2, skip=skip)
        is_last = (li == depth - 1)
        x = conv_transpose1d_btc(
            x, dec["wt"], dec["bt"], stride=cfg["stride"],
            relu=(li < depth - 1),                  # original index > 0
            out_dtype=jnp.float32 if is_last else jnp.bfloat16)

    x = x[:, :length, :].transpose(0, 2, 1).astype(jnp.float32)   # back to NCT
    return std * x


# ----------------------------------------------------------------------------
if __name__ == "__main__":
    cfg = dict(
        chin=1, chout=1, hidden=8, depth=2, kernel_size=8, stride=4,
        causal=True, resample=1, growth=2, max_hidden=10000,
        normalize=True, glu=True, rescale=0.1, floor=1e-3, sample_rate=16000,
    )
    key = jax.random.PRNGKey(0)
    key, kparams, kx = jax.random.split(key, 3)
    params = init_demucs_params(kparams, cfg)

    # Input audio mix: (batch=2, time=64); forward unsqueezes the channel dim.
    mix = jax.random.normal(kx, (2, 64), dtype=jnp.float32)

    forward = jax.jit(lambda p, m: demucs_forward(p, m, cfg))
    out = forward(params, mix)
    out = jax.block_until_ready(out)
    assert out.shape == (2, 1, 64), out.shape
    assert bool(jnp.all(jnp.isfinite(out)))
    print("KERNEL_OK")
</pallas_src>

<mosaic_0001>
module attributes {stable_mosaic.version = 11 : i64} {
  func.func @kernel(%arg0: i32, %arg1: i32, %arg2: i32, %arg3: memref<32x128xbf16, #tpu.memory_space<vmem>>, %arg4: memref<32x128xbf16, #tpu.memory_space<vmem>>, %arg5: memref<128x128xbf16, #tpu.memory_space<vmem>>, %arg6: memref<128x128xbf16, #tpu.memory_space<vmem>>, %arg7: memref<1x128xf32, #tpu.memory_space<vmem>>, %arg8: memref<32x128xbf16, #tpu.memory_space<vmem>>, %arg9: memref<32x128xf32, #tpu.memory_space<vmem>>) attributes {dimension_semantics = [#tpu.dimension_semantics<parallel>, #tpu.dimension_semantics<parallel>, #tpu.dimension_semantics<arbitrary>], iteration_bounds = array<i64: 1, 1, 1>, scalar_prefetch = 0 : i64, scratch_operands = 1 : i64, tpu.core_type = #tpu.core_type<tc>, window_params = [{transform_indices = @transform_0, window_bounds = array<i64: 32, 128>}, {transform_indices = @transform_1, window_bounds = array<i64: 32, 128>}, {transform_indices = @transform_2, window_bounds = array<i64: 128, 128>}, {transform_indices = @transform_3, window_bounds = array<i64: 128, 128>}, {transform_indices = @transform_4, window_bounds = array<i64: 1, 128>}, {transform_indices = @transform_5, window_bounds = array<i64: 32, 128>}]} {
    %c0_i32 = arith.constant 0 : i32
    %0 = arith.cmpi eq, %arg2, %c0_i32 : i32
    %1 = arith.extui %0 : i1 to i32
    %c0_i32_0 = arith.constant 0 : i32
    %2 = arith.cmpi ne, %1, %c0_i32_0 : i32
    scf.if %2 {
      %cst_15 = arith.constant 0.000000e+00 : f32
      %16 = vector.broadcast %cst_15 : f32 to vector<32x128xf32>
      %c0_16 = arith.constant 0 : index
      %c0_17 = arith.constant 0 : index
      %17 = vector.load %arg9[%c0_16, %c0_17] : memref<32x128xf32, #tpu.memory_space<vmem>>, vector<32x128xf32>
      tpu.vector_store %arg9[%c0_16, %c0_17], %16 {strides = array<i32>} : memref<32x128xf32, #tpu.memory_space<vmem>>, vector<32x128xf32>,
    } else {
    }
    %c0 = arith.constant 0 : index
    %c0_1 = arith.constant 0 : index
    %3 = vector.load %arg3[%c0, %c0_1] : memref<32x128xbf16, #tpu.memory_space<vmem>>, vector<32x128xbf16>
    %c0_2 = arith.constant 0 : index
    %c0_3 = arith.constant 0 : index
    %4 = vector.load %arg5[%c0_2, %c0_3] : memref<128x128xbf16, #tpu.memory_space<vmem>>, vector<128x128xbf16>
    %cst = arith.constant dense<0.000000e+00> : vector<32x128xf32>
    %5 = tpu.matmul %3, %4, %cst {dimension_numbers = #tpu.dot_dimension_numbers<[1], [0], [0], [1], [0, 0, 1, 1], [], []>} : vector<32x128xbf16>, vector<128x128xbf16>, vector<32x128xf32> -> vector<32x128xf32>
    %c0_4 = arith.constant 0 : index
    %c0_5 = arith.constant 0 : index
    %6 = vector.load %arg4[%c0_4, %c0_5] : memref<32x128xbf16, #tpu.memory_space<vmem>>, vector<32x128xbf16>
    %c0_6 = arith.constant 0 : index
    %c0_7 = arith.constant 0 : index
    %7 = vector.load %arg6[%c0_6, %c0_7] : memref<128x128xbf16, #tpu.memory_space<vmem>>, vector<128x128xbf16>
    %cst_8 = arith.constant dense<0.000000e+00> : vector<32x128xf32>
    %8 = tpu.matmul %6, %7, %cst_8 {dimension_numbers = #tpu.dot_dimension_numbers<[1], [0], [0], [1], [0, 0, 1, 1], [], []>} : vector<32x128xbf16>, vector<128x128xbf16>, vector<32x128xf32> -> vector<32x128xf32>
    %9 = arith.addf %5, %8 : vector<32x128xf32>
    %c0_9 = arith.constant 0 : index
    %c0_10 = arith.constant 0 : index
    %10 = vector.load %arg9[%c0_9, %c0_10] : memref<32x128xf32, #tpu.memory_space<vmem>>, vector<32x128xf32>
    %11 = arith.addf %10, %9 : vector<32x128xf32>
    %c0_11 = arith.constant 0 : index
    %c0_12 = arith.constant 0 : index
    %12 = vector.load %arg9[%c0_11, %c0_12] : memref<32x128xf32, #tpu.memory_space<vmem>>, vector<32x128xf32>
    tpu.vector_store %arg9[%c0_11, %c0_12], %11 {strides = array<i32>} : memref<32x128xf32, #tpu.memory_space<vmem>>, vector<32x128xf32>,
    %c0_i32_13 = arith.constant 0 : i32
    %13 = arith.cmpi eq, %arg2, %c0_i32_13 : i32
    %14 = arith.extui %13 : i1 to i32
    %c0_i32_14 = arith.constant 0 : i32
    %15 = arith.cmpi ne, %14, %c0_i32_14 : i32
    scf.if %15 {
      %c0_15 = arith.constant 0 : index
      %c0_16 = arith.constant 0 : index
      %16 = vector.load %arg9[%c0_15, %c0_16] : memref<32x128xf32, #tpu.memory_space<vmem>>, vector<32x128xf32>
      %c0_17 = arith.constant 0 : index
      %c0_18 = arith.constant 0 : index
      %17 = vector.load %arg7[%c0_17, %c0_18] : memref<1x128xf32, #tpu.memory_space<vmem>>, vector<1x128xf32>
      %18 = vector.broadcast %17 : vector<1x128xf32> to vector<32x128xf32>
      %19 = arith.addf %16, %18 : vector<32x128xf32>
      %cst_19 = arith.constant 0.000000e+00 : f32
      %20 = vector.broadcast %cst_19 : f32 to vector<32x128xf32>
      %21 = arith.maximumf %19, %20 : vector<32x128xf32>
      %22 = arith.truncf %21 : vector<32x128xf32> to vector<32x128xbf16>
      %c0_20 = arith.constant 0 : index
      %c0_21 = arith.constant 0 : index
      %23 = vector.load %arg8[%c0_20, %c0_21] : memref<32x128xbf16, #tpu.memory_space<vmem>>, vector<32x128xbf16>
      tpu.vector_store %arg8[%c0_20, %c0_21], %22 {strides = array<i32>} : memref<32x128xbf16, #tpu.memory_space<vmem>>, vector<32x128xbf16>,
    } else {
    }
    return
  }
  func.func @transform_0(%arg0: i32, %arg1: i32, %arg2: i32) -> (i32, i32) {
    %c0_i32 = arith.constant 0 : i32
    return %arg0, %arg2 : i32, i32
  }
  func.func @transform_1(%arg0: i32, %arg1: i32, %arg2: i32) -> (i32, i32) {
    %c0_i32 = arith.constant 0 : i32
    return %arg0, %arg2 : i32, i32
  }
  func.func @transform_2(%arg0: i32, %arg1: i32, %arg2: i32) -> (i32, i32) {
    %c0_i32 = arith.constant 0 : i32
    return %arg2, %arg1 : i32, i32
  }
  func.func @transform_3(%arg0: i32, %arg1: i32, %arg2: i32) -> (i32, i32) {
    %c0_i32 = arith.constant 0 : i32
    return %arg2, %arg1 : i32, i32
  }
  func.func @transform_4(%arg0: i32, %arg1: i32, %arg2: i32) -> (i32, i32) {
    %c0_i32 = arith.constant 0 : i32
    %c0_i32_0 = arith.constant 0 : i32
    return %c0_i32, %arg1 : i32, i32
  }
  func.func @transform_5(%arg0: i32, %arg1: i32, %arg2: i32) -> (i32, i32) {
    %c0_i32 = arith.constant 0 : i32
    return %arg0, %arg1 : i32, i32
  }
}

module attributes {stable_mosaic.version = 11 : i64} {
  func.func @kernel(%arg0: i32, %arg1: i32, %arg2: i32, %arg3: memref<8x128xbf16, #tpu.memory_space<vmem>>, %arg4: memref<8x128xbf16, #tpu.memory_space<vmem>>, %arg5: memref<128x128xbf16, #tpu.memory_space<vmem>>, %arg6: memref<128x128xbf16, #tpu.memory_space<vmem>>, %arg7: memref<1x128xf32, #tpu.memory_space<vmem>>, %arg8: memref<8x128xbf16, #tpu.memory_space<vmem>>, %arg9: memref<8x128xf32, #tpu.memory_space<vmem>>) attributes {dimension_semantics = [#tpu.dimension_semantics<parallel>, #tpu.dimension_semantics<parallel>, #tpu.dimension_semantics<arbitrary>], iteration_bounds = array<i64: 1, 1, 1>, scalar_prefetch = 0 : i64, scratch_operands = 1 : i64, tpu.core_type = #tpu.core_type<tc>, window_params = [{transform_indices = @transform_0, window_bounds = array<i64: 8, 128>}, {transform_indices = @transform_1, window_bounds = array<i64: 8, 128>}, {transform_indices = @transform_2, window_bounds = array<i64: 128, 128>}, {transform_indices = @transform_3, window_bounds = array<i64: 128, 128>}, {transform_indices = @transform_4, window_bounds = array<i64: 1, 128>}, {transform_indices = @transform_5, window_bounds = array<i64: 8, 128>}]} {
    %c0_i32 = arith.constant 0 : i32
    %0 = arith.cmpi eq, %arg2, %c0_i32 : i32
    %1 = arith.extui %0 : i1 to i32
    %c0_i32_0 = arith.constant 0 : i32
    %2 = arith.cmpi ne, %1, %c0_i32_0 : i32
    scf.if %2 {
      %cst_15 = arith.constant 0.000000e+00 : f32
      %16 = vector.broadcast %cst_15 : f32 to vector<8x128xf32>
      %c0_16 = arith.constant 0 : index
      %c0_17 = arith.constant 0 : index
      %17 = vector.load %arg9[%c0_16, %c0_17] : memref<8x128xf32, #tpu.memory_space<vmem>>, vector<8x128xf32>
      tpu.vector_store %arg9[%c0_16, %c0_17], %16 {strides = array<i32>} : memref<8x128xf32, #tpu.memory_space<vmem>>, vector<8x128xf32>,
    } else {
    }
    %c0 = arith.constant 0 : index
    %c0_1 = arith.constant 0 : index
    %3 = vector.load %arg3[%c0, %c0_1] : memref<8x128xbf16, #tpu.memory_space<vmem>>, vector<8x128xbf16>
    %c0_2 = arith.constant 0 : index
    %c0_3 = arith.constant 0 : index
    %4 = vector.load %arg5[%c0_2, %c0_3] : memref<128x128xbf16, #tpu.memory_space<vmem>>, vector<128x128xbf16>
    %cst = arith.constant dense<0.000000e+00> : vector<8x128xf32>
    %5 = tpu.matmul %3, %4, %cst {dimension_numbers = #tpu.dot_dimension_numbers<[1], [0], [0], [1], [0, 0, 1, 1], [], []>} : vector<8x128xbf16>, vector<128x128xbf16>, vector<8x128xf32> -> vector<8x128xf32>
    %c0_4 = arith.constant 0 : index
    %c0_5 = arith.constant 0 : index
    %6 = vector.load %arg4[%c0_4, %c0_5] : memref<8x128xbf16, #tpu.memory_space<vmem>>, vector<8x128xbf16>
    %c0_6 = arith.constant 0 : index
    %c0_7 = arith.constant 0 : index
    %7 = vector.load %arg6[%c0_6, %c0_7] : memref<128x128xbf16, #tpu.memory_space<vmem>>, vector<128x128xbf16>
    %cst_8 = arith.constant dense<0.000000e+00> : vector<8x128xf32>
    %8 = tpu.matmul %6, %7, %cst_8 {dimension_numbers = #tpu.dot_dimension_numbers<[1], [0], [0], [1], [0, 0, 1, 1], [], []>} : vector<8x128xbf16>, vector<128x128xbf16>, vector<8x128xf32> -> vector<8x128xf32>
    %9 = arith.addf %5, %8 : vector<8x128xf32>
    %c0_9 = arith.constant 0 : index
    %c0_10 = arith.constant 0 : index
    %10 = vector.load %arg9[%c0_9, %c0_10] : memref<8x128xf32, #tpu.memory_space<vmem>>, vector<8x128xf32>
    %11 = arith.addf %10, %9 : vector<8x128xf32>
    %c0_11 = arith.constant 0 : index
    %c0_12 = arith.constant 0 : index
    %12 = vector.load %arg9[%c0_11, %c0_12] : memref<8x128xf32, #tpu.memory_space<vmem>>, vector<8x128xf32>
    tpu.vector_store %arg9[%c0_11, %c0_12], %11 {strides = array<i32>} : memref<8x128xf32, #tpu.memory_space<vmem>>, vector<8x128xf32>,
    %c0_i32_13 = arith.constant 0 : i32
    %13 = arith.cmpi eq, %arg2, %c0_i32_13 : i32
    %14 = arith.extui %13 : i1 to i32
    %c0_i32_14 = arith.constant 0 : i32
    %15 = arith.cmpi ne, %14, %c0_i32_14 : i32
    scf.if %15 {
      %c0_15 = arith.constant 0 : index
      %c0_16 = arith.constant 0 : index
      %16 = vector.load %arg9[%c0_15, %c0_16] : memref<8x128xf32, #tpu.memory_space<vmem>>, vector<8x128xf32>
      %c0_17 = arith.constant 0 : index
      %c0_18 = arith.constant 0 : index
      %17 = vector.load %arg7[%c0_17, %c0_18] : memref<1x128xf32, #tpu.memory_space<vmem>>, vector<1x128xf32>
      %18 = vector.broadcast %17 : vector<1x128xf32> to vector<8x128xf32>
      %19 = arith.addf %16, %18 : vector<8x128xf32>
      %cst_19 = arith.constant 0.000000e+00 : f32
      %20 = vector.broadcast %cst_19 : f32 to vector<8x128xf32>
      %21 = arith.maximumf %19, %20 : vector<8x128xf32>
      %22 = arith.truncf %21 : vector<8x128xf32> to vector<8x128xbf16>
      %c0_20 = arith.constant 0 : index
      %c0_21 = arith.constant 0 : index
      %23 = vector.load %arg8[%c0_20, %c0_21] : memref<8x128xbf16, #tpu.memory_space<vmem>>, vector<8x128xbf16>
      tpu.vector_store %arg8[%c0_20, %c0_21], %22 {strides = array<i32>} : memref<8x128xbf16, #tpu.memory_space<vmem>>, vector<8x128xbf16>,
    } else {
    }
    return
  }
  func.func @transform_0(%arg0: i32, %arg1: i32, %arg2: i32) -> (i32, i32) {
    %c0_i32 = arith.constant 0 : i32
    return %arg0, %arg2 : i32, i32
  }
  func.func @transform_1(%arg0: i32, %arg1: i32, %arg2: i32) -> (i32, i32) {
    %c0_i32 = arith.constant 0 : i32
    return %arg0, %arg2 : i32, i32
  }
  func.func @transform_2(%arg0: i32, %arg1: i32, %arg2: i32) -> (i32, i32) {
    %c0_i32 = arith.constant 0 : i32
    return %arg2, %arg1 : i32, i32
  }
  func.func @transform_3(%arg0: i32, %arg1: i32, %arg2: i32) -> (i32, i32) {
    %c0_i32 = arith.constant 0 : i32
    return %arg2, %arg1 : i32, i32
  }
  func.func @transform_4(%arg0: i32, %arg1: i32, %arg2: i32) -> (i32, i32) {
    %c0_i32 = arith.constant 0 : i32
    %c0_i32_0 = arith.constant 0 : i32
    return %c0_i32, %arg1 : i32, i32
  }
  func.func @transform_5(%arg0: i32, %arg1: i32, %arg2: i32) -> (i32, i32) {
    %c0_i32 = arith.constant 0 : i32
    return %arg0, %arg1 : i32, i32
  }
}

module attributes {stable_mosaic.version = 11 : i64} {
  func.func @kernel(%arg0: i32, %arg1: i32, %arg2: i32, %arg3: memref<32x128xbf16, #tpu.memory_space<vmem>>, %arg4: memref<128x128xbf16, #tpu.memory_space<vmem>>, %arg5: memref<128x128xbf16, #tpu.memory_space<vmem>>, %arg6: memref<1x128xf32, #tpu.memory_space<vmem>>, %arg7: memref<1x128xf32, #tpu.memory_space<vmem>>, %arg8: memref<32x128xbf16, #tpu.memory_space<vmem>>, %arg9: memref<32x128xf32, #tpu.memory_space<vmem>>, %arg10: memref<32x128xf32, #tpu.memory_space<vmem>>) attributes {dimension_semantics = [#tpu.dimension_semantics<parallel>, #tpu.dimension_semantics<parallel>, #tpu.dimension_semantics<arbitrary>], iteration_bounds = array<i64: 1, 1, 1>, scalar_prefetch = 0 : i64, scratch_operands = 2 : i64, tpu.core_type = #tpu.core_type<tc>, window_params = [{transform_indices = @transform_0, window_bounds = array<i64: 32, 128>}, {transform_indices = @transform_1, window_bounds = array<i64: 128, 128>}, {transform_indices = @transform_2, window_bounds = array<i64: 128, 128>}, {transform_indices = @transform_3, window_bounds = array<i64: 1, 128>}, {transform_indices = @transform_4, window_bounds = array<i64: 1, 128>}, {transform_indices = @transform_5, window_bounds = array<i64: 32, 128>}]} {
    %c0_i32 = arith.constant 0 : i32
    %0 = arith.cmpi eq, %arg2, %c0_i32 : i32
    %1 = arith.extui %0 : i1 to i32
    %c0_i32_0 = arith.constant 0 : i32
    %2 = arith.cmpi ne, %1, %c0_i32_0 : i32
    scf.if %2 {
      %cst_17 = arith.constant 0.000000e+00 : f32
      %17 = vector.broadcast %cst_17 : f32 to vector<32x128xf32>
      %c0_18 = arith.constant 0 : index
      %c0_19 = arith.constant 0 : index
      %18 = vector.load %arg9[%c0_18, %c0_19] : memref<32x128xf32, #tpu.memory_space<vmem>>, vector<32x128xf32>
      tpu.vector_store %arg9[%c0_18, %c0_19], %17 {strides = array<i32>} : memref<32x128xf32, #tpu.memory_space<vmem>>, vector<32x128xf32>,
      %cst_20 = arith.constant 0.000000e+00 : f32
      %19 = vector.broadcast %cst_20 : f32 to vector<32x128xf32>
      %c0_21 = arith.constant 0 : index
      %c0_22 = arith.constant 0 : index
      %20 = vector.load %arg10[%c0_21, %c0_22] : memref<32x128xf32, #tpu.memory_space<vmem>>, vector<32x128xf32>
      tpu.vector_store %arg10[%c0_21, %c0_22], %19 {strides = array<i32>} : memref<32x128xf32, #tpu.memory_space<vmem>>, vector<32x128xf32>,
    } else {
    }
    %c0 = arith.constant 0 : index
    %c0_1 = arith.constant 0 : index
    %3 = vector.load %arg3[%c0, %c0_1] : memref<32x128xbf16, #tpu.memory_space<vmem>>, vector<32x128xbf16>
    %c0_2 = arith.constant 0 : index
    %c0_3 = arith.constant 0 : index
    %4 = vector.load %arg9[%c0_2, %c0_3] : memref<32x128xf32, #tpu.memory_space<vmem>>, vector<32x128xf32>
    %c0_4 = arith.constant 0 : index
    %c0_5 = arith.constant 0 : index
    %5 = vector.load %arg4[%c0_4, %c0_5] : memref<128x128xbf16, #tpu.memory_space<vmem>>, vector<128x128xbf16>
    %cst = arith.constant dense<0.000000e+00> : vector<32x128xf32>
    %6 = tpu.matmul %3, %5, %cst {dimension_numbers = #tpu.dot_dimension_numbers<[1], [0], [0], [1], [0, 0, 1, 1], [], []>} : vector<32x128xbf16>, vector<128x128xbf16>, vector<32x128xf32> -> vector<32x128xf32>
    %7 = arith.addf %4, %6 : vector<32x128xf32>
    %c0_6 = arith.constant 0 : index
    %c0_7 = arith.constant 0 : index
    %8 = vector.load %arg9[%c0_6, %c0_7] : memref<32x128xf32, #tpu.memory_space<vmem>>, vector<32x128xf32>
    tpu.vector_store %arg9[%c0_6, %c0_7], %7 {strides = array<i32>} : memref<32x128xf32, #tpu.memory_space<vmem>>, vector<32x128xf32>,
    %c0_8 = arith.constant 0 : index
    %c0_9 = arith.constant 0 : index
    %9 = vector.load %arg10[%c0_8, %c0_9] : memref<32x128xf32, #tpu.memory_space<vmem>>, vector<32x128xf32>
    %c0_10 = arith.constant 0 : index
    %c0_11 = arith.constant 0 : index
    %10 = vector.load %arg5[%c0_10, %c0_11] : memref<128x128xbf16, #tpu.memory_space<vmem>>, vector<128x128xbf16>
    %cst_12 = arith.constant dense<0.000000e+00> : vector<32x128xf32>
    %11 = tpu.matmul %3, %10, %cst_12 {dimension_numbers = #tpu.dot_dimension_numbers<[1], [0], [0], [1], [0, 0, 1, 1], [], []>} : vector<32x128xbf16>, vector<128x128xbf16>, vector<32x128xf32> -> vector<32x128xf32>
    %12 = arith.addf %9, %11 : vector<32x128xf32>
    %c0_13 = arith.constant 0 : index
    %c0_14 = arith.constant 0 : index
    %13 = vector.load %arg10[%c0_13, %c0_14] : memref<32x128xf32, #tpu.memory_space<vmem>>, vector<32x128xf32>
    tpu.vector_store %arg10[%c0_13, %c0_14], %12 {strides = array<i32>} : memref<32x128xf32, #tpu.memory_space<vmem>>, vector<32x128xf32>,
    %c0_i32_15 = arith.constant 0 : i32
    %14 = arith.cmpi eq, %arg2, %c0_i32_15 : i32
    %15 = arith.extui %14 : i1 to i32
    %c0_i32_16 = arith.constant 0 : i32
    %16 = arith.cmpi ne, %15, %c0_i32_16 : i32
    scf.if %16 {
      %c0_17 = arith.constant 0 : index
      %c0_18 = arith.constant 0 : index
      %17 = vector.load %arg9[%c0_17, %c0_18] : memref<32x128xf32, #tpu.memory_space<vmem>>, vector<32x128xf32>
      %c0_19 = arith.constant 0 : index
      %c0_20 = arith.constant 0 : index
      %18 = vector.load %arg6[%c0_19, %c0_20] : memref<1x128xf32, #tpu.memory_space<vmem>>, vector<1x128xf32>
      %19 = vector.broadcast %18 : vector<1x128xf32> to vector<32x128xf32>
      %20 = arith.addf %17, %19 : vector<32x128xf32>
      %c0_21 = arith.constant 0 : index
      %c0_22 = arith.constant 0 : index
      %21 = vector.load %arg10[%c0_21, %c0_22] : memref<32x128xf32, #tpu.memory_space<vmem>>, vector<32x128xf32>
      %c0_23 = arith.constant 0 : index
      %c0_24 = arith.constant 0 : index
      %22 = vector.load %arg7[%c0_23, %c0_24] : memref<1x128xf32, #tpu.memory_space<vmem>>, vector<1x128xf32>
      %23 = vector.broadcast %22 : vector<1x128xf32> to vector<32x128xf32>
      %24 = arith.addf %21, %23 : vector<32x128xf32>
      %25 = arith.negf %24 : vector<32x128xf32>
      %26 = math.exp %25 : vector<32x128xf32>
      %cst_25 = arith.constant 1.000000e+00 : f32
      %27 = vector.broadcast %cst_25 : f32 to vector<32x128xf32>
      %28 = arith.addf %27, %26 : vector<32x128xf32>
      %29 = arith.divf %27, %28 : vector<32x128xf32>
      %30 = arith.mulf %20, %29 : vector<32x128xf32>
      %31 = arith.truncf %30 : vector<32x128xf32> to vector<32x128xbf16>
      %c0_26 = arith.constant 0 : index
      %c0_27 = arith.constant 0 : index
      %32 = vector.load %arg8[%c0_26, %c0_27] : memref<32x128xbf16, #tpu.memory_space<vmem>>, vector<32x128xbf16>
      tpu.vector_store %arg8[%c0_26, %c0_27], %31 {strides = array<i32>} : memref<32x128xbf16, #tpu.memory_space<vmem>>, vector<32x128xbf16>,
    } else {
    }
    return
  }
  func.func @transform_0(%arg0: i32, %arg1: i32, %arg2: i32) -> (i32, i32) {
    %c0_i32 = arith.constant 0 : i32
    return %arg0, %arg2 : i32, i32
  }
  func.func @transform_1(%arg0: i32, %arg1: i32, %arg2: i32) -> (i32, i32) {
    %c0_i32 = arith.constant 0 : i32
    return %arg2, %arg1 : i32, i32
  }
  func.func @transform_2(%arg0: i32, %arg1: i32, %arg2: i32) -> (i32, i32) {
    %c0_i32 = arith.constant 0 : i32
    return %arg2, %arg1 : i32, i32
  }
  func.func @transform_3(%arg0: i32, %arg1: i32, %arg2: i32) -> (i32, i32) {
    %c0_i32 = arith.constant 0 : i32
    %c0_i32_0 = arith.constant 0 : i32
    return %c0_i32, %arg1 : i32, i32
  }
  func.func @transform_4(%arg0: i32, %arg1: i32, %arg2: i32) -> (i32, i32) {
    %c0_i32 = arith.constant 0 : i32
    %c0_i32_0 = arith.constant 0 : i32
    return %c0_i32, %arg1 : i32, i32
  }
  func.func @transform_5(%arg0: i32, %arg1: i32, %arg2: i32) -> (i32, i32) {
    %c0_i32 = arith.constant 0 : i32
    return %arg0, %arg1 : i32, i32
  }
}

module attributes {stable_mosaic.version = 11 : i64} {
  func.func @kernel(%arg0: i32, %arg1: i32, %arg2: i32, %arg3: memref<8x128xbf16, #tpu.memory_space<vmem>>, %arg4: memref<128x128xbf16, #tpu.memory_space<vmem>>, %arg5: memref<128x128xbf16, #tpu.memory_space<vmem>>, %arg6: memref<1x128xf32, #tpu.memory_space<vmem>>, %arg7: memref<1x128xf32, #tpu.memory_space<vmem>>, %arg8: memref<8x128xbf16, #tpu.memory_space<vmem>>, %arg9: memref<8x128xf32, #tpu.memory_space<vmem>>, %arg10: memref<8x128xf32, #tpu.memory_space<vmem>>) attributes {dimension_semantics = [#tpu.dimension_semantics<parallel>, #tpu.dimension_semantics<parallel>, #tpu.dimension_semantics<arbitrary>], iteration_bounds = array<i64: 1, 1, 1>, scalar_prefetch = 0 : i64, scratch_operands = 2 : i64, tpu.core_type = #tpu.core_type<tc>, window_params = [{transform_indices = @transform_0, window_bounds = array<i64: 8, 128>}, {transform_indices = @transform_1, window_bounds = array<i64: 128, 128>}, {transform_indices = @transform_2, window_bounds = array<i64: 128, 128>}, {transform_indices = @transform_3, window_bounds = array<i64: 1, 128>}, {transform_indices = @transform_4, window_bounds = array<i64: 1, 128>}, {transform_indices = @transform_5, window_bounds = array<i64: 8, 128>}]} {
    %c0_i32 = arith.constant 0 : i32
    %0 = arith.cmpi eq, %arg2, %c0_i32 : i32
    %1 = arith.extui %0 : i1 to i32
    %c0_i32_0 = arith.constant 0 : i32
    %2 = arith.cmpi ne, %1, %c0_i32_0 : i32
    scf.if %2 {
      %cst_17 = arith.constant 0.000000e+00 : f32
      %17 = vector.broadcast %cst_17 : f32 to vector<8x128xf32>
      %c0_18 = arith.constant 0 : index
      %c0_19 = arith.constant 0 : index
      %18 = vector.load %arg9[%c0_18, %c0_19] : memref<8x128xf32, #tpu.memory_space<vmem>>, vector<8x128xf32>
      tpu.vector_store %arg9[%c0_18, %c0_19], %17 {strides = array<i32>} : memref<8x128xf32, #tpu.memory_space<vmem>>, vector<8x128xf32>,
      %cst_20 = arith.constant 0.000000e+00 : f32
      %19 = vector.broadcast %cst_20 : f32 to vector<8x128xf32>
      %c0_21 = arith.constant 0 : index
      %c0_22 = arith.constant 0 : index
      %20 = vector.load %arg10[%c0_21, %c0_22] : memref<8x128xf32, #tpu.memory_space<vmem>>, vector<8x128xf32>
      tpu.vector_store %arg10[%c0_21, %c0_22], %19 {strides = array<i32>} : memref<8x128xf32, #tpu.memory_space<vmem>>, vector<8x128xf32>,
    } else {
    }
    %c0 = arith.constant 0 : index
    %c0_1 = arith.constant 0 : index
    %3 = vector.load %arg3[%c0, %c0_1] : memref<8x128xbf16, #tpu.memory_space<vmem>>, vector<8x128xbf16>
    %c0_2 = arith.constant 0 : index
    %c0_3 = arith.constant 0 : index
    %4 = vector.load %arg9[%c0_2, %c0_3] : memref<8x128xf32, #tpu.memory_space<vmem>>, vector<8x128xf32>
    %c0_4 = arith.constant 0 : index
    %c0_5 = arith.constant 0 : index
    %5 = vector.load %arg4[%c0_4, %c0_5] : memref<128x128xbf16, #tpu.memory_space<vmem>>, vector<128x128xbf16>
    %cst = arith.constant dense<0.000000e+00> : vector<8x128xf32>
    %6 = tpu.matmul %3, %5, %cst {dimension_numbers = #tpu.dot_dimension_numbers<[1], [0], [0], [1], [0, 0, 1, 1], [], []>} : vector<8x128xbf16>, vector<128x128xbf16>, vector<8x128xf32> -> vector<8x128xf32>
    %7 = arith.addf %4, %6 : vector<8x128xf32>
    %c0_6 = arith.constant 0 : index
    %c0_7 = arith.constant 0 : index
    %8 = vector.load %arg9[%c0_6, %c0_7] : memref<8x128xf32, #tpu.memory_space<vmem>>, vector<8x128xf32>
    tpu.vector_store %arg9[%c0_6, %c0_7], %7 {strides = array<i32>} : memref<8x128xf32, #tpu.memory_space<vmem>>, vector<8x128xf32>,
    %c0_8 = arith.constant 0 : index
    %c0_9 = arith.constant 0 : index
    %9 = vector.load %arg10[%c0_8, %c0_9] : memref<8x128xf32, #tpu.memory_space<vmem>>, vector<8x128xf32>
    %c0_10 = arith.constant 0 : index
    %c0_11 = arith.constant 0 : index
    %10 = vector.load %arg5[%c0_10, %c0_11] : memref<128x128xbf16, #tpu.memory_space<vmem>>, vector<128x128xbf16>
    %cst_12 = arith.constant dense<0.000000e+00> : vector<8x128xf32>
    %11 = tpu.matmul %3, %10, %cst_12 {dimension_numbers = #tpu.dot_dimension_numbers<[1], [0], [0], [1], [0, 0, 1, 1], [], []>} : vector<8x128xbf16>, vector<128x128xbf16>, vector<8x128xf32> -> vector<8x128xf32>
    %12 = arith.addf %9, %11 : vector<8x128xf32>
    %c0_13 = arith.constant 0 : index
    %c0_14 = arith.constant 0 : index
    %13 = vector.load %arg10[%c0_13, %c0_14] : memref<8x128xf32, #tpu.memory_space<vmem>>, vector<8x128xf32>
    tpu.vector_store %arg10[%c0_13, %c0_14], %12 {strides = array<i32>} : memref<8x128xf32, #tpu.memory_space<vmem>>, vector<8x128xf32>,
    %c0_i32_15 = arith.constant 0 : i32
    %14 = arith.cmpi eq, %arg2, %c0_i32_15 : i32
    %15 = arith.extui %14 : i1 to i32
    %c0_i32_16 = arith.constant 0 : i32
    %16 = arith.cmpi ne, %15, %c0_i32_16 : i32
    scf.if %16 {
      %c0_17 = arith.constant 0 : index
      %c0_18 = arith.constant 0 : index
      %17 = vector.load %arg9[%c0_17, %c0_18] : memref<8x128xf32, #tpu.memory_space<vmem>>, vector<8x128xf32>
      %c0_19 = arith.constant 0 : index
      %c0_20 = arith.constant 0 : index
      %18 = vector.load %arg6[%c0_19, %c0_20] : memref<1x128xf32, #tpu.memory_space<vmem>>, vector<1x128xf32>
      %19 = vector.broadcast %18 : vector<1x128xf32> to vector<8x128xf32>
      %20 = arith.addf %17, %19 : vector<8x128xf32>
      %c0_21 = arith.constant 0 : index
      %c0_22 = arith.constant 0 : index
      %21 = vector.load %arg10[%c0_21, %c0_22] : memref<8x128xf32, #tpu.memory_space<vmem>>, vector<8x128xf32>
      %c0_23 = arith.constant 0 : index
      %c0_24 = arith.constant 0 : index
      %22 = vector.load %arg7[%c0_23, %c0_24] : memref<1x128xf32, #tpu.memory_space<vmem>>, vector<1x128xf32>
      %23 = vector.broadcast %22 : vector<1x128xf32> to vector<8x128xf32>
      %24 = arith.addf %21, %23 : vector<8x128xf32>
      %25 = arith.negf %24 : vector<8x128xf32>
      %26 = math.exp %25 : vector<8x128xf32>
      %cst_25 = arith.constant 1.000000e+00 : f32
      %27 = vector.broadcast %cst_25 : f32 to vector<8x128xf32>
      %28 = arith.addf %27, %26 : vector<8x128xf32>
      %29 = arith.divf %27, %28 : vector<8x128xf32>
      %30 = arith.mulf %20, %29 : vector<8x128xf32>
      %31 = arith.truncf %30 : vector<8x128xf32> to vector<8x128xbf16>
      %c0_26 = arith.constant 0 : index
      %c0_27 = arith.constant 0 : index
      %32 = vector.load %arg8[%c0_26, %c0_27] : memref<8x128xbf16, #tpu.memory_space<vmem>>, vector<8x128xbf16>
      tpu.vector_store %arg8[%c0_26, %c0_27], %31 {strides = array<i32>} : memref<8x128xbf16, #tpu.memory_space<vmem>>, vector<8x128xbf16>,
    } else {
    }
    return
  }
  func.func @transform_0(%arg0: i32, %arg1: i32, %arg2: i32) -> (i32, i32) {
    %c0_i32 = arith.constant 0 : i32
    return %arg0, %arg2 : i32, i32
  }
  func.func @transform_1(%arg0: i32, %arg1: i32, %arg2: i32) -> (i32, i32) {
    %c0_i32 = arith.constant 0 : i32
    return %arg2, %arg1 : i32, i32
  }
  func.func @transform_2(%arg0: i32, %arg1: i32, %arg2: i32) -> (i32, i32) {
    %c0_i32 = arith.constant 0 : i32
    return %arg2, %arg1 : i32, i32
  }
  func.func @transform_3(%arg0: i32, %arg1: i32, %arg2: i32) -> (i32, i32) {
    %c0_i32 = arith.constant 0 : i32
    %c0_i32_0 = arith.constant 0 : i32
    return %c0_i32, %arg1 : i32, i32
  }
  func.func @transform_4(%arg0: i32, %arg1: i32, %arg2: i32) -> (i32, i32) {
    %c0_i32 = arith.constant 0 : i32
    %c0_i32_0 = arith.constant 0 : i32
    return %c0_i32, %arg1 : i32, i32
  }
  func.func @transform_5(%arg0: i32, %arg1: i32, %arg2: i32) -> (i32, i32) {
    %c0_i32 = arith.constant 0 : i32
    return %arg0, %arg1 : i32, i32
  }
}

module attributes {stable_mosaic.version = 11 : i64} {
  func.func @kernel(%arg0: i32, %arg1: i32, %arg2: i32, %arg3: memref<8x128xbf16, #tpu.memory_space<vmem>>, %arg4: memref<128x512xbf16, #tpu.memory_space<vmem>>, %arg5: memref<1x512xf32, #tpu.memory_space<vmem>>, %arg6: memref<8x512xbf16, #tpu.memory_space<vmem>>, %arg7: memref<8x512xf32, #tpu.memory_space<vmem>>) attributes {dimension_semantics = [#tpu.dimension_semantics<parallel>, #tpu.dimension_semantics<parallel>, #tpu.dimension_semantics<arbitrary>], iteration_bounds = array<i64: 1, 1, 1>, scalar_prefetch = 0 : i64, scratch_operands = 1 : i64, tpu.core_type = #tpu.core_type<tc>, window_params = [{transform_indices = @transform_0, window_bounds = array<i64: 8, 128>}, {transform_indices = @transform_1, window_bounds = array<i64: 128, 512>}, {transform_indices = @transform_2, window_bounds = array<i64: 1, 512>}, {transform_indices = @transform_3, window_bounds = array<i64: 8, 512>}]} {
    %c0_i32 = arith.constant 0 : i32
    %0 = arith.cmpi eq, %arg2, %c0_i32 : i32
    %1 = arith.extui %0 : i1 to i32
    %c0_i32_0 = arith.constant 0 : i32
    %2 = arith.cmpi ne, %1, %c0_i32_0 : i32
    scf.if %2 {
      %cst_10 = arith.constant 0.000000e+00 : f32
      %12 = vector.broadcast %cst_10 : f32 to vector<8x512xf32>
      %c0_11 = arith.constant 0 : index
      %c0_12 = arith.constant 0 : index
      %13 = vector.load %arg7[%c0_11, %c0_12] : memref<8x512xf32, #tpu.memory_space<vmem>>, vector<8x512xf32>
      tpu.vector_store %arg7[%c0_11, %c0_12], %12 {strides = array<i32>} : memref<8x512xf32, #tpu.memory_space<vmem>>, vector<8x512xf32>,
    } else {
    }
    %c0 = arith.constant 0 : index
    %c0_1 = arith.constant 0 : index
    %3 = vector.load %arg3[%c0, %c0_1] : memref<8x128xbf16, #tpu.memory_space<vmem>>, vector<8x128xbf16>
    %c0_2 = arith.constant 0 : index
    %c0_3 = arith.constant 0 : index
    %4 = vector.load %arg4[%c0_2, %c0_3] : memref<128x512xbf16, #tpu.memory_space<vmem>>, vector<128x512xbf16>
    %cst = arith.constant dense<0.000000e+00> : vector<8x512xf32>
    %5 = tpu.matmul %3, %4, %cst {dimension_numbers = #tpu.dot_dimension_numbers<[1], [0], [0], [1], [0, 0, 1, 1], [], []>} : vector<8x128xbf16>, vector<128x512xbf16>, vector<8x512xf32> -> vector<8x512xf32>
    %c0_4 = arith.constant 0 : index
    %c0_5 = arith.constant 0 : index
    %6 = vector.load %arg7[%c0_4, %c0_5] : memref<8x512xf32, #tpu.memory_space<vmem>>, vector<8x512xf32>
    %7 = arith.addf %6, %5 : vector<8x512xf32>
    %c0_6 = arith.constant 0 : index
    %c0_7 = arith.constant 0 : index
    %8 = vector.load %arg7[%c0_6, %c0_7] : memref<8x512xf32, #tpu.memory_space<vmem>>, vector<8x512xf32>
    tpu.vector_store %arg7[%c0_6, %c0_7], %7 {strides = array<i32>} : memref<8x512xf32, #tpu.memory_space<vmem>>, vector<8x512xf32>,
    %c0_i32_8 = arith.constant 0 : i32
    %9 = arith.cmpi eq, %arg2, %c0_i32_8 : i32
    %10 = arith.extui %9 : i1 to i32
    %c0_i32_9 = arith.constant 0 : i32
    %11 = arith.cmpi ne, %10, %c0_i32_9 : i32
    scf.if %11 {
      %c0_10 = arith.constant 0 : index
      %c0_11 = arith.constant 0 : index
      %12 = vector.load %arg7[%c0_10, %c0_11] : memref<8x512xf32, #tpu.memory_space<vmem>>, vector<8x512xf32>
      %c0_12 = arith.constant 0 : index
      %c0_13 = arith.constant 0 : index
      %13 = vector.load %arg5[%c0_12, %c0_13] : memref<1x512xf32, #tpu.memory_space<vmem>>, vector<1x512xf32>
      %14 = vector.broadcast %13 : vector<1x512xf32> to vector<8x512xf32>
      %15 = arith.addf %12, %14 : vector<8x512xf32>
      %16 = arith.truncf %15 : vector<8x512xf32> to vector<8x512xbf16>
      %c0_14 = arith.constant 0 : index
      %c0_15 = arith.constant 0 : index
      %17 = vector.load %arg6[%c0_14, %c0_15] : memref<8x512xbf16, #tpu.memory_space<vmem>>, vector<8x512xbf16>
      tpu.vector_store %arg6[%c0_14, %c0_15], %16 {strides = array<i32>} : memref<8x512xbf16, #tpu.memory_space<vmem>>, vector<8x512xbf16>,
    } else {
    }
    return
  }
  func.func @transform_0(%arg0: i32, %arg1: i32, %arg2: i32) -> (i32, i32) {
    %c0_i32 = arith.constant 0 : i32
    return %arg0, %arg2 : i32, i32
  }
  func.func @transform_1(%arg0: i32, %arg1: i32, %arg2: i32) -> (i32, i32) {
    %c0_i32 = arith.constant 0 : i32
    return %arg2, %arg1 : i32, i32
  }
  func.func @transform_2(%arg0: i32, %arg1: i32, %arg2: i32) -> (i32, i32) {
    %c0_i32 = arith.constant 0 : i32
    %c0_i32_0 = arith.constant 0 : i32
    return %c0_i32, %arg1 : i32, i32
  }
  func.func @transform_3(%arg0: i32, %arg1: i32, %arg2: i32) -> (i32, i32) {
    %c0_i32 = arith.constant 0 : i32
    return %arg0, %arg1 : i32, i32
  }
}

module attributes {stable_mosaic.version = 11 : i64} {
  func.func @kernel(%arg0: i32, %arg1: i32, %arg2: i32, %arg3: memref<8x128xbf16, #tpu.memory_space<vmem>>, %arg4: memref<8x128xbf16, #tpu.memory_space<vmem>>, %arg5: memref<128x128xbf16, #tpu.memory_space<vmem>>, %arg6: memref<128x128xbf16, #tpu.memory_space<vmem>>, %arg7: memref<1x128xf32, #tpu.memory_space<vmem>>, %arg8: memref<1x128xf32, #tpu.memory_space<vmem>>, %arg9: memref<8x128xbf16, #tpu.memory_space<vmem>>, %arg10: memref<8x128xf32, #tpu.memory_space<vmem>>, %arg11: memref<8x128xf32, #tpu.memory_space<vmem>>) attributes {dimension_semantics = [#tpu.dimension_semantics<parallel>, #tpu.dimension_semantics<parallel>, #tpu.dimension_semantics<arbitrary>], iteration_bounds = array<i64: 1, 1, 1>, scalar_prefetch = 0 : i64, scratch_operands = 2 : i64, tpu.core_type = #tpu.core_type<tc>, window_params = [{transform_indices = @transform_0, window_bounds = array<i64: 8, 128>}, {transform_indices = @transform_1, window_bounds = array<i64: 8, 128>}, {transform_indices = @transform_2, window_bounds = array<i64: 128, 128>}, {transform_indices = @transform_3, window_bounds = array<i64: 128, 128>}, {transform_indices = @transform_4, window_bounds = array<i64: 1, 128>}, {transform_indices = @transform_5, window_bounds = array<i64: 1, 128>}, {transform_indices = @transform_6, window_bounds = array<i64: 8, 128>}]} {
    %c0_i32 = arith.constant 0 : i32
    %0 = arith.cmpi eq, %arg2, %c0_i32 : i32
    %1 = arith.extui %0 : i1 to i32
    %c0_i32_0 = arith.constant 0 : i32
    %2 = arith.cmpi ne, %1, %c0_i32_0 : i32
    scf.if %2 {
      %cst_19 = arith.constant 0.000000e+00 : f32
      %19 = vector.broadcast %cst_19 : f32 to vector<8x128xf32>
      %c0_20 = arith.constant 0 : index
      %c0_21 = arith.constant 0 : index
      %20 = vector.load %arg10[%c0_20, %c0_21] : memref<8x128xf32, #tpu.memory_space<vmem>>, vector<8x128xf32>
      tpu.vector_store %arg10[%c0_20, %c0_21], %19 {strides = array<i32>} : memref<8x128xf32, #tpu.memory_space<vmem>>, vector<8x128xf32>,
      %cst_22 = arith.constant 0.000000e+00 : f32
      %21 = vector.broadcast %cst_22 : f32 to vector<8x128xf32>
      %c0_23 = arith.constant 0 : index
      %c0_24 = arith.constant 0 : index
      %22 = vector.load %arg11[%c0_23, %c0_24] : memref<8x128xf32, #tpu.memory_space<vmem>>, vector<8x128xf32>
      tpu.vector_store %arg11[%c0_23, %c0_24], %21 {strides = array<i32>} : memref<8x128xf32, #tpu.memory_space<vmem>>, vector<8x128xf32>,
    } else {
    }
    %c0 = arith.constant 0 : index
    %c0_1 = arith.constant 0 : index
    %3 = vector.load %arg3[%c0, %c0_1] : memref<8x128xbf16, #tpu.memory_space<vmem>>, vector<8x128xbf16>
    %c0_2 = arith.constant 0 : index
    %c0_3 = arith.constant 0 : index
    %4 = vector.load %arg4[%c0_2, %c0_3] : memref<8x128xbf16, #tpu.memory_space<vmem>>, vector<8x128xbf16>
    %5 = arith.addf %3, %4 : vector<8x128xbf16>
    %c0_4 = arith.constant 0 : index
    %c0_5 = arith.constant 0 : index
    %6 = vector.load %arg10[%c0_4, %c0_5] : memref<8x128xf32, #tpu.memory_space<vmem>>, vector<8x128xf32>
    %c0_6 = arith.constant 0 : index
    %c0_7 = arith.constant 0 : index
    %7 = vector.load %arg5[%c0_6, %c0_7] : memref<128x128xbf16, #tpu.memory_space<vmem>>, vector<128x128xbf16>
    %cst = arith.constant dense<0.000000e+00> : vector<8x128xf32>
    %8 = tpu.matmul %5, %7, %cst {dimension_numbers = #tpu.dot_dimension_numbers<[1], [0], [0], [1], [0, 0, 1, 1], [], []>} : vector<8x128xbf16>, vector<128x128xbf16>, vector<8x128xf32> -> vector<8x128xf32>
    %9 = arith.addf %6, %8 : vector<8x128xf32>
    %c0_8 = arith.constant 0 : index
    %c0_9 = arith.constant 0 : index
    %10 = vector.load %arg10[%c0_8, %c0_9] : memref<8x128xf32, #tpu.memory_space<vmem>>, vector<8x128xf32>
    tpu.vector_store %arg10[%c0_8, %c0_9], %9 {strides = array<i32>} : memref<8x128xf32, #tpu.memory_space<vmem>>, vector<8x128xf32>,
    %c0_10 = arith.constant 0 : index
    %c0_11 = arith.constant 0 : index
    %11 = vector.load %arg11[%c0_10, %c0_11] : memref<8x128xf32, #tpu.memory_space<vmem>>, vector<8x128xf32>
    %c0_12 = arith.constant 0 : index
    %c0_13 = arith.constant 0 : index
    %12 = vector.load %arg6[%c0_12, %c0_13] : memref<128x128xbf16, #tpu.memory_space<vmem>>, vector<128x128xbf16>
    %cst_14 = arith.constant dense<0.000000e+00> : vector<8x128xf32>
    %13 = tpu.matmul %5, %12, %cst_14 {dimension_numbers = #tpu.dot_dimension_numbers<[1], [0], [0], [1], [0, 0, 1, 1], [], []>} : vector<8x128xbf16>, vector<128x128xbf16>, vector<8x128xf32> -> vector<8x128xf32>
    %14 = arith.addf %11, %13 : vector<8x128xf32>
    %c0_15 = arith.constant 0 : index
    %c0_16 = arith.constant 0 : index
    %15 = vector.load %arg11[%c0_15, %c0_16] : memref<8x128xf32, #tpu.memory_space<vmem>>, vector<8x128xf32>
    tpu.vector_store %arg11[%c0_15, %c0_16], %14 {strides = array<i32>} : memref<8x128xf32, #tpu.memory_space<vmem>>, vector<8x128xf32>,
    %c0_i32_17 = arith.constant 0 : i32
    %16 = arith.cmpi eq, %arg2, %c0_i32_17 : i32
    %17 = arith.extui %16 : i1 to i32
    %c0_i32_18 = arith.constant 0 : i32
    %18 = arith.cmpi ne, %17, %c0_i32_18 : i32
    scf.if %18 {
      %c0_19 = arith.constant 0 : index
      %c0_20 = arith.constant 0 : index
      %19 = vector.load %arg10[%c0_19, %c0_20] : memref<8x128xf32, #tpu.memory_space<vmem>>, vector<8x128xf32>
      %c0_21 = arith.constant 0 : index
      %c0_22 = arith.constant 0 : index
      %20 = vector.load %arg7[%c0_21, %c0_22] : memref<1x128xf32, #tpu.memory_space<vmem>>, vector<1x128xf32>
      %21 = vector.broadcast %20 : vector<1x128xf32> to vector<8x128xf32>
      %22 = arith.addf %19, %21 : vector<8x128xf32>
      %c0_23 = arith.constant 0 : index
      %c0_24 = arith.constant 0 : index
      %23 = vector.load %arg11[%c0_23, %c0_24] : memref<8x128xf32, #tpu.memory_space<vmem>>, vector<8x128xf32>
      %c0_25 = arith.constant 0 : index
      %c0_26 = arith.constant 0 : index
      %24 = vector.load %arg8[%c0_25, %c0_26] : memref<1x128xf32, #tpu.memory_space<vmem>>, vector<1x128xf32>
      %25 = vector.broadcast %24 : vector<1x128xf32> to vector<8x128xf32>
      %26 = arith.addf %23, %25 : vector<8x128xf32>
      %27 = arith.negf %26 : vector<8x128xf32>
      %28 = math.exp %27 : vector<8x128xf32>
      %cst_27 = arith.constant 1.000000e+00 : f32
      %29 = vector.broadcast %cst_27 : f32 to vector<8x128xf32>
      %30 = arith.addf %29, %28 : vector<8x128xf32>
      %31 = arith.divf %29, %30 : vector<8x128xf32>
      %32 = arith.mulf %22, %31 : vector<8x128xf32>
      %33 = arith.truncf %32 : vector<8x128xf32> to vector<8x128xbf16>
      %c0_28 = arith.constant 0 : index
      %c0_29 = arith.constant 0 : index
      %34 = vector.load %arg9[%c0_28, %c0_29] : memref<8x128xbf16, #tpu.memory_space<vmem>>, vector<8x128xbf16>
      tpu.vector_store %arg9[%c0_28, %c0_29], %33 {strides = array<i32>} : memref<8x128xbf16, #tpu.memory_space<vmem>>, vector<8x128xbf16>,
    } else {
    }
    return
  }
  func.func @transform_0(%arg0: i32, %arg1: i32, %arg2: i32) -> (i32, i32) {
    %c0_i32 = arith.constant 0 : i32
    return %arg0, %arg2 : i32, i32
  }
  func.func @transform_1(%arg0: i32, %arg1: i32, %arg2: i32) -> (i32, i32) {
    %c0_i32 = arith.constant 0 : i32
    return %arg0, %arg2 : i32, i32
  }
  func.func @transform_2(%arg0: i32, %arg1: i32, %arg2: i32) -> (i32, i32) {
    %c0_i32 = arith.constant 0 : i32
    return %arg2, %arg1 : i32, i32
  }
  func.func @transform_3(%arg0: i32, %arg1: i32, %arg2: i32) -> (i32, i32) {
    %c0_i32 = arith.constant 0 : i32
    return %arg2, %arg1 : i32, i32
  }
  func.func @transform_4(%arg0: i32, %arg1: i32, %arg2: i32) -> (i32, i32) {
    %c0_i32 = arith.constant 0 : i32
    %c0_i32_0 = arith.constant 0 : i32
    return %c0_i32, %arg1 : i32, i32
  }
  func.func @transform_5(%arg0: i32, %arg1: i32, %arg2: i32) -> (i32, i32) {
    %c0_i32 = arith.constant 0 : i32
    %c0_i32_0 = arith.constant 0 : i32
    return %c0_i32, %arg1 : i32, i32
  }
  func.func @transform_6(%arg0: i32, %arg1: i32, %arg2: i32) -> (i32, i32) {
    %c0_i32 = arith.constant 0 : i32
    return %arg0, %arg1 : i32, i32
  }
}

module attributes {stable_mosaic.version = 11 : i64} {
  func.func @_lstm_step_kernel(%arg0: i32, %arg1: memref<3x2x512xbf16, #tpu.memory_space<vmem>>, %arg2: memref<128x512xbf16, #tpu.memory_space<vmem>>, %arg3: memref<3x2x128xf32, #tpu.memory_space<vmem>>, %arg4: memref<2x128xf32, #tpu.memory_space<vmem>>, %arg5: memref<2x128xf32, #tpu.memory_space<vmem>>) attributes {dimension_semantics = [#tpu.dimension_semantics<arbitrary>], iteration_bounds = array<i64: 1>, scalar_prefetch = 0 : i64, scratch_operands = 2 : i64, tpu.core_type = #tpu.core_type<tc>, window_params = [{transform_indices = @transform_0, window_bounds = array<i64: 3, 2, 512>}, {pipeline_mode = #tpu.pipeline_mode<synchronous>, transform_indices = @transform_1, window_bounds = array<i64: 128, 512>}, {transform_indices = @transform_2, window_bounds = array<i64: 3, 2, 128>}]} {
    %c0_i32 = arith.constant 0 : i32
    %0 = arith.cmpi eq, %arg0, %c0_i32 : i32
    %1 = arith.extui %0 : i1 to i32
    %c0_i32_0 = arith.constant 0 : i32
    %2 = arith.cmpi ne, %1, %c0_i32_0 : i32
    scf.if %2 {
      %cst = arith.constant 0.000000e+00 : f32
      %10 = vector.broadcast %cst : f32 to vector<2x128xf32>
      %c0_12 = arith.constant 0 : index
      %c0_13 = arith.constant 0 : index
      %11 = vector.load %arg4[%c0_12, %c0_13] : memref<2x128xf32, #tpu.memory_space<vmem>>, vector<2x128xf32>
      tpu.vector_store %arg4[%c0_12, %c0_13], %10 {strides = array<i32>} : memref<2x128xf32, #tpu.memory_space<vmem>>, vector<2x128xf32>,
      %cst_14 = arith.constant 0.000000e+00 : f32
      %12 = vector.broadcast %cst_14 : f32 to vector<2x128xf32>
      %c0_15 = arith.constant 0 : index
      %c0_16 = arith.constant 0 : index
      %13 = vector.load %arg5[%c0_15, %c0_16] : memref<2x128xf32, #tpu.memory_space<vmem>>, vector<2x128xf32>
      tpu.vector_store %arg5[%c0_15, %c0_16], %12 {strides = array<i32>} : memref<2x128xf32, #tpu.memory_space<vmem>>, vector<2x128xf32>,
    } else {
    }
    %c0 = arith.constant 0 : index
    %c0_1 = arith.constant 0 : index
    %3 = vector.load %arg2[%c0, %c0_1] : memref<128x512xbf16, #tpu.memory_space<vmem>>, vector<128x512xbf16>
    %c0_2 = arith.constant 0 : index
    %c0_3 = arith.constant 0 : index
    %4 = vector.load %arg4[%c0_2, %c0_3] : memref<2x128xf32, #tpu.memory_space<vmem>>, vector<2x128xf32>
    %c0_4 = arith.constant 0 : index
    %c0_5 = arith.constant 0 : index
    %5 = vector.load %arg5[%c0_4, %c0_5] : memref<2x128xf32, #tpu.memory_space<vmem>>, vector<2x128xf32>
    %c0_i32_6 = arith.constant 0 : i32
    %c3_i32 = arith.constant 3 : i32
    %6 = arith.addi %c0_i32_6, %c3_i32 : i32
    %c1_i32 = arith.constant 1 : i32
    %7:2 = scf.for %arg6 = %c0_i32_6 to %6 step %c1_i32 iter_args(%arg7 = %4, %arg8 = %5) -> (vector<2x128xf32>, vector<2x128xf32>)  : i32 {
      %10 = arith.index_cast %arg6 : i32 to index
      %c0_12 = arith.constant 0 : index
      %c0_13 = arith.constant 0 : index
      %11 = vector.load %arg1[%10, %c0_12, %c0_13] : memref<3x2x512xbf16, #tpu.memory_space<vmem>>, vector<1x2x512xbf16>
      %12 = vector.shape_cast %11 : vector<1x2x512xbf16> to vector<2x512xbf16>
      %13 = arith.extf %12 : vector<2x512xbf16> to vector<2x512xf32>
      %14 = arith.truncf %arg7 : vector<2x128xf32> to vector<2x128xbf16>
      %cst = arith.constant dense<0.000000e+00> : vector<2x512xf32>
      %15 = tpu.matmul %14, %3, %cst {dimension_numbers = #tpu.dot_dimension_numbers<[1], [0], [0], [1], [0, 0, 1, 1], [], []>} : vector<2x128xbf16>, vector<128x512xbf16>, vector<2x512xf32> -> vector<2x512xf32>
      %16 = arith.addf %13, %15 : vector<2x512xf32>
      %17 = vector.extract_strided_slice %16 {offsets = [0, 0], sizes = [2, 128], strides = [1, 1]} : vector<2x512xf32> to vector<2x128xf32>
      %18 = arith.negf %17 : vector<2x128xf32>
      %19 = math.exp %18 : vector<2x128xf32>
      %cst_14 = arith.constant 1.000000e+00 : f32
      %20 = vector.broadcast %cst_14 : f32 to vector<2x128xf32>
      %21 = arith.addf %20, %19 : vector<2x128xf32>
      %22 = arith.divf %20, %21 : vector<2x128xf32>
      %23 = vector.extract_strided_slice %16 {offsets = [0, 128], sizes = [2, 128], strides = [1, 1]} : vector<2x512xf32> to vector<2x128xf32>
      %24 = arith.negf %23 : vector<2x128xf32>
      %25 = math.exp %24 : vector<2x128xf32>
      %cst_15 = arith.constant 1.000000e+00 : f32
      %26 = vector.broadcast %cst_15 : f32 to vector<2x128xf32>
      %27 = arith.addf %26, %25 : vector<2x128xf32>
      %28 = arith.divf %26, %27 : vector<2x128xf32>
      %29 = vector.extract_strided_slice %16 {offsets = [0, 256], sizes = [2, 128], strides = [1, 1]} : vector<2x512xf32> to vector<2x128xf32>
      %30 = math.tanh %29 : vector<2x128xf32>
      %31 = vector.extract_strided_slice %16 {offsets = [0, 384], sizes = [2, 128], strides = [1, 1]} : vector<2x512xf32> to vector<2x128xf32>
      %32 = arith.negf %31 : vector<2x128xf32>
      %33 = math.exp %32 : vector<2x128xf32>
      %cst_16 = arith.constant 1.000000e+00 : f32
      %34 = vector.broadcast %cst_16 : f32 to vector<2x128xf32>
      %35 = arith.addf %34, %33 : vector<2x128xf32>
      %36 = arith.divf %34, %35 : vector<2x128xf32>
      %37 = arith.mulf %28, %arg8 : vector<2x128xf32>
      %38 = arith.mulf %22, %30 : vector<2x128xf32>
      %39 = arith.addf %37, %38 : vector<2x128xf32>
      %40 = math.tanh %39 : vector<2x128xf32>
      %41 = arith.mulf %36, %40 : vector<2x128xf32>
      %42 = arith.index_cast %arg6 : i32 to index
      %c0_17 = arith.constant 0 : index
      %c0_18 = arith.constant 0 : index
      %43 = vector.load %arg3[%42, %c0_17, %c0_18] : memref<3x2x128xf32, #tpu.memory_space<vmem>>, vector<1x2x128xf32>
      %44 = vector.shape_cast %43 : vector<1x2x128xf32> to vector<2x128xf32>
      %45 = vector.shape_cast %41 : vector<2x128xf32> to vector<1x2x128xf32>
      tpu.vector_store %arg3[%42, %c0_17, %c0_18], %45 {strides = array<i32>} : memref<3x2x128xf32, #tpu.memory_space<vmem>>, vector<1x2x128xf32>,
      scf.yield %41, %39 : vector<2x128xf32>, vector<2x128xf32>
    }
    %c3_i32_7 = arith.constant 3 : i32
    %c0_8 = arith.constant 0 : index
    %c0_9 = arith.constant 0 : index
    %8 = vector.load %arg4[%c0_8, %c0_9] : memref<2x128xf32, #tpu.memory_space<vmem>>, vector<2x128xf32>
    tpu.vector_store %arg4[%c0_8, %c0_9], %7#0 {strides = array<i32>} : memref<2x128xf32, #tpu.memory_space<vmem>>, vector<2x128xf32>,
    %c0_10 = arith.constant 0 : index
    %c0_11 = arith.constant 0 : index
    %9 = vector.load %arg5[%c0_10, %c0_11] : memref<2x128xf32, #tpu.memory_space<vmem>>, vector<2x128xf32>
    tpu.vector_store %arg5[%c0_10, %c0_11], %7#1 {strides = array<i32>} : memref<2x128xf32, #tpu.memory_space<vmem>>, vector<2x128xf32>,
    return
  }
  func.func @transform_0(%arg0: i32) -> (i32, i32, i32) {
    %c0_i32 = arith.constant 0 : i32
    %c0_i32_0 = arith.constant 0 : i32
    %c0_i32_1 = arith.constant 0 : i32
    return %arg0, %c0_i32, %c0_i32_0 : i32, i32, i32
  }
  func.func @transform_1(%arg0: i32) -> (i32, i32) {
    %c0_i32 = arith.constant 0 : i32
    %c0_i32_0 = arith.constant 0 : i32
    %c0_i32_1 = arith.constant 0 : i32
    return %c0_i32, %c0_i32_0 : i32, i32
  }
  func.func @transform_2(%arg0: i32) -> (i32, i32, i32) {
    %c0_i32 = arith.constant 0 : i32
    %c0_i32_0 = arith.constant 0 : i32
    %c0_i32_1 = arith.constant 0 : i32
    return %arg0, %c0_i32, %c0_i32_0 : i32, i32, i32
  }
}

module attributes {stable_mosaic.version = 11 : i64} {
  func.func @kernel(%arg0: i32, %arg1: i32, %arg2: i32, %arg3: memref<32x128xbf16, #tpu.memory_space<vmem>>, %arg4: memref<32x128xbf16, #tpu.memory_space<vmem>>, %arg5: memref<128x128xbf16, #tpu.memory_space<vmem>>, %arg6: memref<128x128xbf16, #tpu.memory_space<vmem>>, %arg7: memref<1x128xf32, #tpu.memory_space<vmem>>, %arg8: memref<1x128xf32, #tpu.memory_space<vmem>>, %arg9: memref<32x128xbf16, #tpu.memory_space<vmem>>, %arg10: memref<32x128xf32, #tpu.memory_space<vmem>>, %arg11: memref<32x128xf32, #tpu.memory_space<vmem>>) attributes {dimension_semantics = [#tpu.dimension_semantics<parallel>, #tpu.dimension_semantics<parallel>, #tpu.dimension_semantics<arbitrary>], iteration_bounds = array<i64: 1, 1, 1>, scalar_prefetch = 0 : i64, scratch_operands = 2 : i64, tpu.core_type = #tpu.core_type<tc>, window_params = [{transform_indices = @transform_0, window_bounds = array<i64: 32, 128>}, {transform_indices = @transform_1, window_bounds = array<i64: 32, 128>}, {transform_indices = @transform_2, window_bounds = array<i64: 128, 128>}, {transform_indices = @transform_3, window_bounds = array<i64: 128, 128>}, {transform_indices = @transform_4, window_bounds = array<i64: 1, 128>}, {transform_indices = @transform_5, window_bounds = array<i64: 1, 128>}, {transform_indices = @transform_6, window_bounds = array<i64: 32, 128>}]} {
    %c0_i32 = arith.constant 0 : i32
    %0 = arith.cmpi eq, %arg2, %c0_i32 : i32
    %1 = arith.extui %0 : i1 to i32
    %c0_i32_0 = arith.constant 0 : i32
    %2 = arith.cmpi ne, %1, %c0_i32_0 : i32
    scf.if %2 {
      %cst_19 = arith.constant 0.000000e+00 : f32
      %19 = vector.broadcast %cst_19 : f32 to vector<32x128xf32>
      %c0_20 = arith.constant 0 : index
      %c0_21 = arith.constant 0 : index
      %20 = vector.load %arg10[%c0_20, %c0_21] : memref<32x128xf32, #tpu.memory_space<vmem>>, vector<32x128xf32>
      tpu.vector_store %arg10[%c0_20, %c0_21], %19 {strides = array<i32>} : memref<32x128xf32, #tpu.memory_space<vmem>>, vector<32x128xf32>,
      %cst_22 = arith.constant 0.000000e+00 : f32
      %21 = vector.broadcast %cst_22 : f32 to vector<32x128xf32>
      %c0_23 = arith.constant 0 : index
      %c0_24 = arith.constant 0 : index
      %22 = vector.load %arg11[%c0_23, %c0_24] : memref<32x128xf32, #tpu.memory_space<vmem>>, vector<32x128xf32>
      tpu.vector_store %arg11[%c0_23, %c0_24], %21 {strides = array<i32>} : memref<32x128xf32, #tpu.memory_space<vmem>>, vector<32x128xf32>,
    } else {
    }
    %c0 = arith.constant 0 : index
    %c0_1 = arith.constant 0 : index
    %3 = vector.load %arg3[%c0, %c0_1] : memref<32x128xbf16, #tpu.memory_space<vmem>>, vector<32x128xbf16>
    %c0_2 = arith.constant 0 : index
    %c0_3 = arith.constant 0 : index
    %4 = vector.load %arg4[%c0_2, %c0_3] : memref<32x128xbf16, #tpu.memory_space<vmem>>, vector<32x128xbf16>
    %5 = arith.addf %3, %4 : vector<32x128xbf16>
    %c0_4 = arith.constant 0 : index
    %c0_5 = arith.constant 0 : index
    %6 = vector.load %arg10[%c0_4, %c0_5] : memref<32x128xf32, #tpu.memory_space<vmem>>, vector<32x128xf32>
    %c0_6 = arith.constant 0 : index
    %c0_7 = arith.constant 0 : index
    %7 = vector.load %arg5[%c0_6, %c0_7] : memref<128x128xbf16, #tpu.memory_space<vmem>>, vector<128x128xbf16>
    %cst = arith.constant dense<0.000000e+00> : vector<32x128xf32>
    %8 = tpu.matmul %5, %7, %cst {dimension_numbers = #tpu.dot_dimension_numbers<[1], [0], [0], [1], [0, 0, 1, 1], [], []>} : vector<32x128xbf16>, vector<128x128xbf16>, vector<32x128xf32> -> vector<32x128xf32>
    %9 = arith.addf %6, %8 : vector<32x128xf32>
    %c0_8 = arith.constant 0 : index
    %c0_9 = arith.constant 0 : index
    %10 = vector.load %arg10[%c0_8, %c0_9] : memref<32x128xf32, #tpu.memory_space<vmem>>, vector<32x128xf32>
    tpu.vector_store %arg10[%c0_8, %c0_9], %9 {strides = array<i32>} : memref<32x128xf32, #tpu.memory_space<vmem>>, vector<32x128xf32>,
    %c0_10 = arith.constant 0 : index
    %c0_11 = arith.constant 0 : index
    %11 = vector.load %arg11[%c0_10, %c0_11] : memref<32x128xf32, #tpu.memory_space<vmem>>, vector<32x128xf32>
    %c0_12 = arith.constant 0 : index
    %c0_13 = arith.constant 0 : index
    %12 = vector.load %arg6[%c0_12, %c0_13] : memref<128x128xbf16, #tpu.memory_space<vmem>>, vector<128x128xbf16>
    %cst_14 = arith.constant dense<0.000000e+00> : vector<32x128xf32>
    %13 = tpu.matmul %5, %12, %cst_14 {dimension_numbers = #tpu.dot_dimension_numbers<[1], [0], [0], [1], [0, 0, 1, 1], [], []>} : vector<32x128xbf16>, vector<128x128xbf16>, vector<32x128xf32> -> vector<32x128xf32>
    %14 = arith.addf %11, %13 : vector<32x128xf32>
    %c0_15 = arith.constant 0 : index
    %c0_16 = arith.constant 0 : index
    %15 = vector.load %arg11[%c0_15, %c0_16] : memref<32x128xf32, #tpu.memory_space<vmem>>, vector<32x128xf32>
    tpu.vector_store %arg11[%c0_15, %c0_16], %14 {strides = array<i32>} : memref<32x128xf32, #tpu.memory_space<vmem>>, vector<32x128xf32>,
    %c0_i32_17 = arith.constant 0 : i32
    %16 = arith.cmpi eq, %arg2, %c0_i32_17 : i32
    %17 = arith.extui %16 : i1 to i32
    %c0_i32_18 = arith.constant 0 : i32
    %18 = arith.cmpi ne, %17, %c0_i32_18 : i32
    scf.if %18 {
      %c0_19 = arith.constant 0 : index
      %c0_20 = arith.constant 0 : index
      %19 = vector.load %arg10[%c0_19, %c0_20] : memref<32x128xf32, #tpu.memory_space<vmem>>, vector<32x128xf32>
      %c0_21 = arith.constant 0 : index
      %c0_22 = arith.constant 0 : index
      %20 = vector.load %arg7[%c0_21, %c0_22] : memref<1x128xf32, #tpu.memory_space<vmem>>, vector<1x128xf32>
      %21 = vector.broadcast %20 : vector<1x128xf32> to vector<32x128xf32>
      %22 = arith.addf %19, %21 : vector<32x128xf32>
      %c0_23 = arith.constant 0 : index
      %c0_24 = arith.constant 0 : index
      %23 = vector.load %arg11[%c0_23, %c0_24] : memref<32x128xf32, #tpu.memory_space<vmem>>, vector<32x128xf32>
      %c0_25 = arith.constant 0 : index
      %c0_26 = arith.constant 0 : index
      %24 = vector.load %arg8[%c0_25, %c0_26] : memref<1x128xf32, #tpu.memory_space<vmem>>, vector<1x128xf32>
      %25 = vector.broadcast %24 : vector<1x128xf32> to vector<32x128xf32>
      %26 = arith.addf %23, %25 : vector<32x128xf32>
      %27 = arith.negf %26 : vector<32x128xf32>
      %28 = math.exp %27 : vector<32x128xf32>
      %cst_27 = arith.constant 1.000000e+00 : f32
      %29 = vector.broadcast %cst_27 : f32 to vector<32x128xf32>
      %30 = arith.addf %29, %28 : vector<32x128xf32>
      %31 = arith.divf %29, %30 : vector<32x128xf32>
      %32 = arith.mulf %22, %31 : vector<32x128xf32>
      %33 = arith.truncf %32 : vector<32x128xf32> to vector<32x128xbf16>
      %c0_28 = arith.constant 0 : index
      %c0_29 = arith.constant 0 : index
      %34 = vector.load %arg9[%c0_28, %c0_29] : memref<32x128xbf16, #tpu.memory_space<vmem>>, vector<32x128xbf16>
      tpu.vector_store %arg9[%c0_28, %c0_29], %33 {strides = array<i32>} : memref<32x128xbf16, #tpu.memory_space<vmem>>, vector<32x128xbf16>,
    } else {
    }
    return
  }
  func.func @transform_0(%arg0: i32, %arg1: i32, %arg2: i32) -> (i32, i32) {
    %c0_i32 = arith.constant 0 : i32
    return %arg0, %arg2 : i32, i32
  }
  func.func @transform_1(%arg0: i32, %arg1: i32, %arg2: i32) -> (i32, i32) {
    %c0_i32 = arith.constant 0 : i32
    return %arg0, %arg2 : i32, i32
  }
  func.func @transform_2(%arg0: i32, %arg1: i32, %arg2: i32) -> (i32, i32) {
    %c0_i32 = arith.constant 0 : i32
    return %arg2, %arg1 : i32, i32
  }
  func.func @transform_3(%arg0: i32, %arg1: i32, %arg2: i32) -> (i32, i32) {
    %c0_i32 = arith.constant 0 : i32
    return %arg2, %arg1 : i32, i32
  }
  func.func @transform_4(%arg0: i32, %arg1: i32, %arg2: i32) -> (i32, i32) {
    %c0_i32 = arith.constant 0 : i32
    %c0_i32_0 = arith.constant 0 : i32
    return %c0_i32, %arg1 : i32, i32
  }
  func.func @transform_5(%arg0: i32, %arg1: i32, %arg2: i32) -> (i32, i32) {
    %c0_i32 = arith.constant 0 : i32
    %c0_i32_0 = arith.constant 0 : i32
    return %c0_i32, %arg1 : i32, i32
  }
  func.func @transform_6(%arg0: i32, %arg1: i32, %arg2: i32) -> (i32, i32) {
    %c0_i32 = arith.constant 0 : i32
    return %arg0, %arg1 : i32, i32
  }
}

module attributes {stable_mosaic.version = 11 : i64} {
  func.func @kernel(%arg0: i32, %arg1: i32, %arg2: i32, %arg3: memref<40x128xbf16, #tpu.memory_space<vmem>>, %arg4: memref<40x128xbf16, #tpu.memory_space<vmem>>, %arg5: memref<128x128xbf16, #tpu.memory_space<vmem>>, %arg6: memref<128x128xbf16, #tpu.memory_space<vmem>>, %arg7: memref<1x128xf32, #tpu.memory_space<vmem>>, %arg8: memref<40x128xf32, #tpu.memory_space<vmem>>, %arg9: memref<40x128xf32, #tpu.memory_space<vmem>>) attributes {dimension_semantics = [#tpu.dimension_semantics<parallel>, #tpu.dimension_semantics<parallel>, #tpu.dimension_semantics<arbitrary>], iteration_bounds = array<i64: 1, 1, 1>, scalar_prefetch = 0 : i64, scratch_operands = 1 : i64, tpu.core_type = #tpu.core_type<tc>, window_params = [{transform_indices = @transform_0, window_bounds = array<i64: 40, 128>}, {transform_indices = @transform_1, window_bounds = array<i64: 40, 128>}, {transform_indices = @transform_2, window_bounds = array<i64: 128, 128>}, {transform_indices = @transform_3, window_bounds = array<i64: 128, 128>}, {transform_indices = @transform_4, window_bounds = array<i64: 1, 128>}, {transform_indices = @transform_5, window_bounds = array<i64: 40, 128>}]} {
    %c0_i32 = arith.constant 0 : i32
    %0 = arith.cmpi eq, %arg2, %c0_i32 : i32
    %1 = arith.extui %0 : i1 to i32
    %c0_i32_0 = arith.constant 0 : i32
    %2 = arith.cmpi ne, %1, %c0_i32_0 : i32
    scf.if %2 {
      %cst_15 = arith.constant 0.000000e+00 : f32
      %16 = vector.broadcast %cst_15 : f32 to vector<40x128xf32>
      %c0_16 = arith.constant 0 : index
      %c0_17 = arith.constant 0 : index
      %17 = vector.load %arg9[%c0_16, %c0_17] : memref<40x128xf32, #tpu.memory_space<vmem>>, vector<40x128xf32>
      tpu.vector_store %arg9[%c0_16, %c0_17], %16 {strides = array<i32>} : memref<40x128xf32, #tpu.memory_space<vmem>>, vector<40x128xf32>,
    } else {
    }
    %c0 = arith.constant 0 : index
    %c0_1 = arith.constant 0 : index
    %3 = vector.load %arg3[%c0, %c0_1] : memref<40x128xbf16, #tpu.memory_space<vmem>>, vector<40x128xbf16>
    %c0_2 = arith.constant 0 : index
    %c0_3 = arith.constant 0 : index
    %4 = vector.load %arg5[%c0_2, %c0_3] : memref<128x128xbf16, #tpu.memory_space<vmem>>, vector<128x128xbf16>
    %cst = arith.constant dense<0.000000e+00> : vector<40x128xf32>
    %5 = tpu.matmul %3, %4, %cst {dimension_numbers = #tpu.dot_dimension_numbers<[1], [0], [0], [1], [0, 0, 1, 1], [], []>} : vector<40x128xbf16>, vector<128x128xbf16>, vector<40x128xf32> -> vector<40x128xf32>
    %c0_4 = arith.constant 0 : index
    %c0_5 = arith.constant 0 : index
    %6 = vector.load %arg4[%c0_4, %c0_5] : memref<40x128xbf16, #tpu.memory_space<vmem>>, vector<40x128xbf16>
    %c0_6 = arith.constant 0 : index
    %c0_7 = arith.constant 0 : index
    %7 = vector.load %arg6[%c0_6, %c0_7] : memref<128x128xbf16, #tpu.memory_space<vmem>>, vector<128x128xbf16>
    %cst_8 = arith.constant dense<0.000000e+00> : vector<40x128xf32>
    %8 = tpu.matmul %6, %7, %cst_8 {dimension_numbers = #tpu.dot_dimension_numbers<[1], [0], [0], [1], [0, 0, 1, 1], [], []>} : vector<40x128xbf16>, vector<128x128xbf16>, vector<40x128xf32> -> vector<40x128xf32>
    %9 = arith.addf %5, %8 : vector<40x128xf32>
    %c0_9 = arith.constant 0 : index
    %c0_10 = arith.constant 0 : index
    %10 = vector.load %arg9[%c0_9, %c0_10] : memref<40x128xf32, #tpu.memory_space<vmem>>, vector<40x128xf32>
    %11 = arith.addf %10, %9 : vector<40x128xf32>
    %c0_11 = arith.constant 0 : index
    %c0_12 = arith.constant 0 : index
    %12 = vector.load %arg9[%c0_11, %c0_12] : memref<40x128xf32, #tpu.memory_space<vmem>>, vector<40x128xf32>
    tpu.vector_store %arg9[%c0_11, %c0_12], %11 {strides = array<i32>} : memref<40x128xf32, #tpu.memory_space<vmem>>, vector<40x128xf32>,
    %c0_i32_13 = arith.constant 0 : i32
    %13 = arith.cmpi eq, %arg2, %c0_i32_13 : i32
    %14 = arith.extui %13 : i1 to i32
    %c0_i32_14 = arith.constant 0 : i32
    %15 = arith.cmpi ne, %14, %c0_i32_14 : i32
    scf.if %15 {
      %c0_15 = arith.constant 0 : index
      %c0_16 = arith.constant 0 : index
      %16 = vector.load %arg9[%c0_15, %c0_16] : memref<40x128xf32, #tpu.memory_space<vmem>>, vector<40x128xf32>
      %c0_17 = arith.constant 0 : index
      %c0_18 = arith.constant 0 : index
      %17 = vector.load %arg7[%c0_17, %c0_18] : memref<1x128xf32, #tpu.memory_space<vmem>>, vector<1x128xf32>
      %18 = vector.broadcast %17 : vector<1x128xf32> to vector<40x128xf32>
      %19 = arith.addf %16, %18 : vector<40x128xf32>
      %c0_19 = arith.constant 0 : index
      %c0_20 = arith.constant 0 : index
      %20 = vector.load %arg8[%c0_19, %c0_20] : memref<40x128xf32, #tpu.memory_space<vmem>>, vector<40x128xf32>
      tpu.vector_store %arg8[%c0_19, %c0_20], %19 {strides = array<i32>} : memref<40x128xf32, #tpu.memory_space<vmem>>, vector<40x128xf32>,
    } else {
    }
    return
  }
  func.func @transform_0(%arg0: i32, %arg1: i32, %arg2: i32) -> (i32, i32) {
    %c0_i32 = arith.constant 0 : i32
    return %arg0, %arg2 : i32, i32
  }
  func.func @transform_1(%arg0: i32, %arg1: i32, %arg2: i32) -> (i32, i32) {
    %c0_i32 = arith.constant 0 : i32
    return %arg0, %arg2 : i32, i32
  }
  func.func @transform_2(%arg0: i32, %arg1: i32, %arg2: i32) -> (i32, i32) {
    %c0_i32 = arith.constant 0 : i32
    return %arg2, %arg1 : i32, i32
  }
  func.func @transform_3(%arg0: i32, %arg1: i32, %arg2: i32) -> (i32, i32) {
    %c0_i32 = arith.constant 0 : i32
    return %arg2, %arg1 : i32, i32
  }
  func.func @transform_4(%arg0: i32, %arg1: i32, %arg2: i32) -> (i32, i32) {
    %c0_i32 = arith.constant 0 : i32
    %c0_i32_0 = arith.constant 0 : i32
    return %c0_i32, %arg1 : i32, i32
  }
  func.func @transform_5(%arg0: i32, %arg1: i32, %arg2: i32) -> (i32, i32) {
    %c0_i32 = arith.constant 0 : i32
    return %arg0, %arg1 : i32, i32
  }
}

</mosaic_0001>

<bundles_post_ra>
// kernel: _lambda_.12
= control target key start
LH: loop header
LB: loop body
LE: loop exit
PB: predicated region body
PF: predicated region fallthrough
CT: control target
= control target key end

     0   :  { %s564_s3 = inlined_call_operand.vmem [shape: bf16[128,128], index: 3, kind: input, shape index: {}]   ;;  %s565_s2 = inlined_call_operand.vmem [shape: bf16[128,128], index: 2, kind: input, shape index: {}]   ;;  %s566_s1 = inlined_call_operand.vmem [shape: bf16[32,128], index: 1, kind: input, shape index: {}]   ;;  %s567_s0 = inlined_call_operand.vmem [shape: bf16[32,128], index: 0, kind: input, shape index: {}]   ;;  %s568_s4 = inlined_call_operand.vmem [shape: f32[1,128], index: 4, kind: input, shape index: {}]   ;;  %s569_s5 = inlined_call_operand.vmem [shape: bf16[32,128], index: 5, kind: output, shape index: {}]  }
   0x1   :  { %v445_v0 = vld [vmem:[%s564_s3 + $0x38] sm:$0xff]   ;;  %v447_v2 = vld [vmem:[%s564_s3 + $0x30] sm:$0xff]   ;;  %v449_v4 = vld [vmem:[%s564_s3 + $0x28] sm:$0xff]  }
   0x2   :  { %v446_v1 = vld [vmem:[%s565_s2 + $0x38] sm:$0xff]   ;;  %405 = vmatprep.subr.bf16.mxu0 %v445_v0  ;;  %v448_v3 = vld [vmem:[%s565_s2 + $0x30] sm:$0xff]   ;;  %v450_v5 = vld [vmem:[%s565_s2 + $0x28] sm:$0xff]  }
   0x3   :  { %425 = vmatprep.subr.bf16.mxu1 %v446_v1  ;;  %406 = vmatpush3.bf16.msra.mxu0 %v445_v0  ;;  %v451_v6 = vld [vmem:[%s564_s3 + $0x20] sm:$0xff]   ;;  %v453_v8 = vld [vmem:[%s564_s3 + $0x18] sm:$0xff]   ;;  %v455_v10 = vld [vmem:[%s564_s3 + $0x10] sm:$0xff]  }
   0x4   :  { %426 = vmatpush3.bf16.msra.mxu1 %v446_v1  ;;  %407 = vmatprep.subr.bf16.mxu0 %v447_v2  ;;  %v452_v7 = vld [vmem:[%s565_s2 + $0x20] sm:$0xff]   ;;  %v454_v9 = vld [vmem:[%s565_s2 + $0x18] sm:$0xff]   ;;  %v456_v11 = vld [vmem:[%s565_s2 + $0x10] sm:$0xff]  }
   0x5   :  { %427 = vmatprep.subr.bf16.mxu1 %v448_v3  ;;  %v461_v12 = vld [vmem:[%s566_s1] sm:$0xff]   ;;  %v457_v14 = vld [vmem:[%s564_s3 + $0x8] sm:$0xff]  }
   0x6   :  { %v462_v13 = vld [vmem:[%s567_s0] sm:$0xff]   ;;  %421 = vmatprep.mubr.bf16.mxu0 %v461_v12  ;;  %v458_v15 = vld [vmem:[%s565_s2 + $0x8] sm:$0xff]  }
   0x7   :  { %408 = vmatpush3.bf16.msra.mxu0 %v447_v2  ;;  %441 = vmatprep.mubr.bf16.mxu1 %v462_v13  ;;  %v459_v16 = vld [vmem:[%s564_s3] sm:$0xff]   ;;  %v463_v18 = vld [vmem:[%s566_s1 + $0x8] sm:$0xff]  }
   0x8   :  { %428 = vmatpush3.bf16.msra.mxu1 %v448_v3  ;;  %409 = vmatprep.subr.bf16.mxu0 %v449_v4  ;;  %v460_v17 = vld [vmem:[%s565_s2] sm:$0xff]   ;;  %v464_v19 = vld [vmem:[%s567_s0 + $0x8] sm:$0xff]  }
   0x9   :  { %429 = vmatprep.subr.bf16.mxu1 %v450_v5  ;;  %v365_v24 = vld [vmem:[%s568_s4] ss:$0 sm:$0xff] }
   0xb   :  { %410 = vmatpush3.bf16.msra.mxu0 %v449_v4 }
   0xc   :  { %430 = vmatpush3.bf16.msra.mxu1 %v450_v5  ;;  %411 = vmatprep.subr.bf16.mxu0 %v451_v6 }
   0xd   :  { %431 = vmatprep.subr.bf16.mxu1 %v452_v7 }
   0xf   :  { %412 = vmatpush3.bf16.msra.mxu0 %v451_v6 }
  0x10   :  { %432 = vmatpush3.bf16.msra.mxu1 %v452_v7  ;;  %413 = vmatprep.subr.bf16.mxu0 %v453_v8 }
  0x11   :  { %433 = vmatprep.subr.bf16.mxu1 %v454_v9 }
  0x13   :  { %414 = vmatpush3.bf16.msra.mxu0 %v453_v8 }
  0x14   :  { %434 = vmatpush3.bf16.msra.mxu1 %v454_v9  ;;  %415 = vmatprep.subr.bf16.mxu0 %v455_v10 }
  0x15   :  { %435 = vmatprep.subr.bf16.mxu1 %v456_v11 }
  0x17   :  { %416 = vmatpush3.bf16.msra.mxu0 %v455_v10 }
  0x18   :  { %436 = vmatpush3.bf16.msra.mxu1 %v456_v11  ;;  %417 = vmatprep.subr.bf16.mxu0 %v457_v14 }
  0x19   :  { %437 = vmatprep.subr.bf16.mxu1 %v458_v15 }
  0x1b   :  { %418 = vmatpush3.bf16.msra.mxu0 %v457_v14 }
  0x1c   :  { %438 = vmatpush3.bf16.msra.mxu1 %v458_v15  ;;  %419 = vmatprep.subr.bf16.mxu0 %v459_v16 }
  0x1d   :  { %439 = vmatprep.subr.bf16.mxu1 %v460_v17 }
  0x1f   :  { %420 = vmatpush3.bf16.msra.mxu0 %v459_v16 }
  0x20   :  { %440 = vmatpush3.bf16.msra.mxu1 %v460_v17 }
  0x22   :  { %422 = vmatmul.mubr.bf16.vlgmr.msra.gmra.mxu0 %v463_v18 }
  0x23   :  { %442 = vmatmul.mubr.bf16.vlgmr.msra.gmra.mxu1 %v464_v19 }
  0xe2   :  { %v423_v20 = vpop.f32.mrf.mxu0 }
  0xe3   :  { %v443_v21 = vpop.f32.mrf.mxu1 }
  0xe4   :  { %v281_v22 = vadd.f32 %v443_v21, %v423_v20  ;;  %v163_v23 = vpop.f32.mrf.mxu0 }
  0xe5   :  { %v272_v25 = vpop.f32.mrf.mxu1 }
  0xe6   :  { %v273_v26 = vadd.f32 %v272_v25, %v163_v23  ;;  %v424_v27 = vpop.f32.mrf.mxu0  ;;  %v315_v29 = vadd.f32 %v365_v24, %v281_v22 }
  0xe7   :  { %v444_v28 = vpop.f32.mrf.mxu1 }
  0xe8   :  { %v284_v30 = vadd.f32 %v444_v28, %v424_v27  ;;  %v166_v31 = vpop.f32.mrf.mxu0  ;;  %v313_v33 = vadd.f32 %v365_v24, %v273_v26  ;;  %v319_v36 = vmax.f32 %v315_v29, 0.0 }
  0xe9   :  { %v275_v32 = vpop.f32.mrf.mxu1 }
  0xea   :  { %v316_v34 = vadd.f32 %v365_v24, %v284_v30  ;;  %v276_v35 = vadd.f32 %v275_v32, %v166_v31  ;;  %v317_v39 = vmax.f32 %v313_v33, 0.0 }
  0xec   :  { %v320_v37 = vmax.f32 %v316_v34, 0.0  ;;  %v314_v38 = vadd.f32 %v365_v24, %v276_v35 }
  0xee   :  { %v382_v40 = vpack.c.bf16 %v320_v37, %v319_v36  ;;  %v318_v41 = vmax.f32 %v314_v38, 0.0 }
  0xf0   :  { %384 = vst [vmem:[%s569_s5 + $0x8] sm:$0xff] %v382_v40   ;;  %v377_v42 = vpack.c.bf16 %v318_v41, %v317_v39 }
  0xf2   :  { %378 = vst [vmem:[%s569_s5] sm:$0xff] %v377_v42  }

// kernel: _lambda_.13
= control target key start
LH: loop header
LB: loop body
LE: loop exit
PB: predicated region body
PF: predicated region fallthrough
CT: control target
= control target key end

     0   :  { %s617_s2 = inlined_call_operand.vmem [shape: bf16[128,128], index: 2, kind: input, shape index: {}]   ;;  %s618_s1 = inlined_call_operand.vmem [shape: bf16[128,128], index: 1, kind: input, shape index: {}]   ;;  %s619_s0 = inlined_call_operand.vmem [shape: bf16[32,128], index: 0, kind: input, shape index: {}]   ;;  %s620_s4 = inlined_call_operand.vmem [shape: f32[1,128], index: 4, kind: input, shape index: {}]   ;;  %s621_s3 = inlined_call_operand.vmem [shape: f32[1,128], index: 3, kind: input, shape index: {}]   ;;  %s622_s5 = inlined_call_operand.vmem [shape: bf16[32,128], index: 5, kind: output, shape index: {}]  }
   0x1   :  { %v487_v0 = vld [vmem:[%s617_s2 + $0x38] sm:$0xff]   ;;  %v488_v1 = vld [vmem:[%s617_s2 + $0x30] sm:$0xff]   ;;  %v489_v2 = vld [vmem:[%s617_s2 + $0x28] sm:$0xff]  }
   0x2   :  { %467 = vmatprep.subr.bf16.mxu1 %v487_v0  ;;  %v494_v3 = vld [vmem:[%s618_s1 + $0x38] sm:$0xff]   ;;  %v490_v4 = vld [vmem:[%s617_s2 + $0x20] sm:$0xff]   ;;  %v496_v5 = vld [vmem:[%s618_s1 + $0x30] sm:$0xff]  }
   0x3   :  { %468 = vmatpush3.bf16.msra.mxu1 %v487_v0  ;;  %447 = vmatprep.subr.bf16.mxu0 %v494_v3  ;;  %v497_v6 = vld [vmem:[%s619_s0] sm:$0xff]   ;;  %v491_v7 = vld [vmem:[%s617_s2 + $0x18] sm:$0xff]   ;;  %v499_v8 = vld [vmem:[%s618_s1 + $0x28] sm:$0xff]  }
   0x4   :  { %469 = vmatprep.subr.bf16.mxu1 %v488_v1  ;;  %448 = vmatpush3.bf16.msra.mxu0 %v494_v3  ;;  %v500_v9 = vld [vmem:[%s618_s1 + $0x20] sm:$0xff]   ;;  %v492_v10 = vld [vmem:[%s617_s2 + $0x10] sm:$0xff]   ;;  %v501_v11 = vld [vmem:[%s618_s1 + $0x18] sm:$0xff]  }
   0x5   :  { %449 = vmatprep.subr.bf16.mxu0 %v496_v5  ;;  %483 = vmatprep.mubr.bf16.mxu1 %v497_v6  ;;  %v493_v12 = vld [vmem:[%s617_s2 + $0x8] sm:$0xff]   ;;  %v502_v13 = vld [vmem:[%s618_s1 + $0x10] sm:$0xff]   ;;  %v495_v14 = vld [vmem:[%s617_s2] sm:$0xff]  }
   0x6   :  { %463 = vmatprep.mubr.bf16.mxu0 %v497_v6  ;;  %v503_v15 = vld [vmem:[%s618_s1 + $0x8] sm:$0xff]   ;;  %v504_v17 = vld [vmem:[%s618_s1] sm:$0xff]  }
   0x7   :  { %470 = vmatpush3.bf16.msra.mxu1 %v488_v1  ;;  %v498_v16 = vld [vmem:[%s619_s0 + $0x8] sm:$0xff]   ;;  %v403_v18 = vld [vmem:[%s620_s4] ss:$0 sm:$0xff] }
   0x8   :  { %471 = vmatprep.subr.bf16.mxu1 %v489_v2  ;;  %450 = vmatpush3.bf16.msra.mxu0 %v496_v5  ;;  %v402_v41 = vld [vmem:[%s621_s3] ss:$0 sm:$0xff] }
   0x9   :  { %451 = vmatprep.subr.bf16.mxu0 %v499_v8 }
   0xb   :  { %472 = vmatpush3.bf16.msra.mxu1 %v489_v2 }
   0xc   :  { %473 = vmatprep.subr.bf16.mxu1 %v490_v4  ;;  %452 = vmatpush3.bf16.msra.mxu0 %v499_v8 }
   0xd   :  { %453 = vmatprep.subr.bf16.mxu0 %v500_v9 }
   0xf   :  { %474 = vmatpush3.bf16.msra.mxu1 %v490_v4 }
  0x10   :  { %475 = vmatprep.subr.bf16.mxu1 %v491_v7  ;;  %454 = vmatpush3.bf16.msra.mxu0 %v500_v9 }
  0x11   :  { %455 = vmatprep.subr.bf16.mxu0 %v501_v11 }
  0x13   :  { %476 = vmatpush3.bf16.msra.mxu1 %v491_v7 }
  0x14   :  { %477 = vmatprep.subr.bf16.mxu1 %v492_v10  ;;  %456 = vmatpush3.bf16.msra.mxu0 %v501_v11 }
  0x15   :  { %457 = vmatprep.subr.bf16.mxu0 %v502_v13 }
  0x17   :  { %478 = vmatpush3.bf16.msra.mxu1 %v492_v10 }
  0x18   :  { %479 = vmatprep.subr.bf16.mxu1 %v493_v12  ;;  %458 = vmatpush3.bf16.msra.mxu0 %v502_v13 }
  0x19   :  { %459 = vmatprep.subr.bf16.mxu0 %v503_v15 }
  0x1b   :  { %480 = vmatpush3.bf16.msra.mxu1 %v493_v12 }
  0x1c   :  { %481 = vmatprep.subr.bf16.mxu1 %v495_v14  ;;  %460 = vmatpush3.bf16.msra.mxu0 %v503_v15 }
  0x1d   :  { %461 = vmatprep.subr.bf16.mxu0 %v504_v17 }
  0x1f   :  { %482 = vmatpush3.bf16.msra.mxu1 %v495_v14 }
  0x20   :  { %462 = vmatpush3.bf16.msra.mxu0 %v504_v17 }
  0x22   :  { %484 = vmatmul.mubr.bf16.vlgmr.msra.gmra.mxu1 %v498_v16 }
  0x23   :  { %464 = vmatmul.mubr.bf16.vlgmr.msra.gmra.mxu0 %v498_v16 }
  0xe2   :  { %v485_v19 = vpop.f32.mrf.mxu1 }
  0xe3   :  { %v330_v20 = vadd.f32 %v485_v19, %v403_v18  ;;  %v465_v38 = vpop.f32.mrf.mxu0 }
  0xe4   :  { %v276_v21 = vpop.f32.mrf.mxu1  ;;  %v315_v43 = vadd.f32 %v465_v38, %v402_v41 }
  0xe5   :  { %v406_v22 = vmul.f32 -1.442695, %v330_v20  ;;  %v328_v23 = vadd.f32 %v403_v18, %v276_v21  ;;  %v151_v40 = vpop.f32.mrf.mxu0 }
  0xe6   :  { %v486_v24 = vpop.f32.mrf.mxu1  ;;  %v313_v50 = vadd.f32 %v402_v41, %v151_v40 }
  0xe7   :  { %505 = vpow2.f32 %v406_v22  ;;  %v404_v25 = vmul.f32 -1.442695, %v328_v23  ;;  %v331_v26 = vadd.f32 %v486_v24, %v403_v18  ;;  %v466_v42 = vpop.f32.mrf.mxu0 }
  0xe8   :  { %v279_v27 = vpop.f32.mrf.mxu1  ;;  %v316_v47 = vadd.f32 %v466_v42, %v402_v41 }
  0xe9   :  { %507 = vpow2.f32 %v404_v25  ;;  %v407_v28 = vmul.f32 -1.442695, %v331_v26  ;;  %v329_v29 = vadd.f32 %v403_v18, %v279_v27  ;;  %v154_v45 = vpop.f32.mrf.mxu0 }
  0xea   :  { %v314_v52 = vadd.f32 %v402_v41, %v154_v45 }
  0xeb   :  { %509 = vpow2.f32 %v407_v28  ;;  %v405_v30 = vmul.f32 -1.442695, %v329_v29 }
  0xed   :  { %511 = vpow2.f32 %v405_v30 }
  0xf4   :  { %v506_v31 = vpop.eup %505 }
  0xf5   :  { %v346_v32 = vadd.f32 1.0, %v506_v31 }
  0xf6   :  { %v508_v33 = vpop.eup %507 }
  0xf7   :  { %v344_v34 = vadd.f32 1.0, %v508_v33  ;;  %513 = vrcp.f32 %v346_v32 }
  0xf8   :  { %v510_v35 = vpop.eup %509 }
  0xf9   :  { %v347_v36 = vadd.f32 1.0, %v510_v35  ;;  %515 = vrcp.f32 %v344_v34 }
  0xfa   :  { %v512_v37 = vpop.eup %511 }
  0xfb   :  { %517 = vrcp.f32 %v347_v36  ;;  %v345_v39 = vadd.f32 1.0, %v512_v37 }
  0xfd   :  { %519 = vrcp.f32 %v345_v39 }
 0x104   :  { %v514_v44 = vpop.eup %513 }
 0x105   :  { %v358_v49 = vmul.f32 %v514_v44, %v315_v43 }
 0x106   :  { %v516_v46 = vpop.eup %515 }
 0x107   :  { %v356_v54 = vmul.f32 %v516_v46, %v313_v50 }
 0x108   :  { %v518_v48 = vpop.eup %517 }
 0x109   :  { %v359_v51 = vmul.f32 %v518_v48, %v316_v47 }
 0x10a   :  { %v520_v53 = vpop.eup %519 }
 0x10b   :  { %v424_v55 = vpack.c.bf16 %v359_v51, %v358_v49  ;;  %v357_v56 = vmul.f32 %v520_v53, %v314_v52 }
 0x10d   :  { %426 = vst [vmem:[%s622_s5 + $0x8] sm:$0xff] %v424_v55   ;;  %v419_v57 = vpack.c.bf16 %v357_v56, %v356_v54 }
 0x10f   :  { %420 = vst [vmem:[%s622_s5] sm:$0xff] %v419_v57  }

// kernel: _lambda_.14
= control target key start
LH: loop header
LB: loop body
LE: loop exit
PB: predicated region body
PF: predicated region fallthrough
CT: control target
= control target key end

     0   :  { %v351_v0 = vmov 0.0   ;;  %vm352_vm0 = vmmov 0   ;;  %s443_s3 = inlined_call_operand.vmem [shape: bf16[128,128], index: 3, kind: input, shape index: {}]   ;;  %s444_s2 = inlined_call_operand.vmem [shape: bf16[128,128], index: 2, kind: input, shape index: {}]   ;;  %s445_s1 = inlined_call_operand.vmem [shape: bf16[8,128], index: 1, kind: input, shape index: {}]   ;;  %s446_s0 = inlined_call_operand.vmem [shape: bf16[8,128], index: 0, kind: input, shape index: {}]   ;;  %s447_s4 = inlined_call_operand.vmem [shape: f32[1,128], index: 4, kind: input, shape index: {}]   ;;  %s448_s5 = inlined_call_operand.vmem [shape: bf16[8,128], index: 5, kind: output, shape index: {}]  }
   0x1   :  { %293 = vmatprep.subr.bf16.mxu0 %v351_v0  ;;  %313 = vmatprep.subr.bf16.mxu1 %v351_v0  ;;  %v335_v1 = vld [vmem:[%s443_s3 + $0x38] sm:$0xff]   ;;  %v337_v3 = vld [vmem:[%s443_s3 + $0x30] sm:$0xff]   ;;  %v339_v5 = vld [vmem:[%s443_s3 + $0x28] sm:$0xff]  }
   0x2   :  { %v336_v2 = vld [vmem:[%s444_s2 + $0x38] sm:$0xff]   ;;  %309 = vmatprep.mubr.msk.bf16.mxu0 %vm352_vm0, %v351_v0  ;;  %329 = vmatprep.mubr.msk.bf16.mxu1 %vm352_vm0, %v351_v0  ;;  %v338_v4 = vld [vmem:[%s444_s2 + $0x30] sm:$0xff]   ;;  %v340_v6 = vld [vmem:[%s444_s2 + $0x28] sm:$0xff]  }
   0x3   :  { %294 = vmatpush3.bf16.msra.mxu0 %v335_v1  ;;  %314 = vmatpush3.bf16.msra.mxu1 %v336_v2  ;;  %v341_v7 = vld [vmem:[%s443_s3 + $0x20] sm:$0xff]   ;;  %v343_v9 = vld [vmem:[%s443_s3 + $0x18] sm:$0xff]   ;;  %v345_v11 = vld [vmem:[%s443_s3 + $0x10] sm:$0xff]  }
   0x4   :  { %295 = vmatprep.subr.bf16.mxu0 %v351_v0  ;;  %315 = vmatprep.subr.bf16.mxu1 %v351_v0  ;;  %v342_v8 = vld [vmem:[%s444_s2 + $0x20] sm:$0xff]   ;;  %v344_v10 = vld [vmem:[%s444_s2 + $0x18] sm:$0xff]   ;;  %v346_v12 = vld [vmem:[%s444_s2 + $0x10] sm:$0xff]  }
   0x5   :  { %v347_v13 = vld [vmem:[%s443_s3 + $0x8] sm:$0xff]   ;;  %v349_v15 = vld [vmem:[%s443_s3] sm:$0xff]  }
   0x6   :  { %v348_v14 = vld [vmem:[%s444_s2 + $0x8] sm:$0xff]   ;;  %v350_v16 = vld [vmem:[%s444_s2] sm:$0xff]  }
   0x7   :  { %296 = vmatpush3.bf16.msra.mxu0 %v337_v3  ;;  %316 = vmatpush3.bf16.msra.mxu1 %v338_v4  ;;  %v43_v17 = vld [vmem:[%s445_s1] sm:$0xf] }
   0x8   :  { %297 = vmatprep.subr.bf16.mxu0 %v351_v0  ;;  %317 = vmatprep.subr.bf16.mxu1 %v351_v0  ;;  %v26_v18 = vld [vmem:[%s446_s0] sm:$0xf] }
   0x9   :  { %v274_v21 = vld [vmem:[%s447_s4] ss:$0 sm:$0xff] }
   0xb   :  { %298 = vmatpush3.bf16.msra.mxu0 %v339_v5  ;;  %318 = vmatpush3.bf16.msra.mxu1 %v340_v6 }
   0xc   :  { %299 = vmatprep.subr.bf16.mxu0 %v351_v0  ;;  %319 = vmatprep.subr.bf16.mxu1 %v351_v0 }
   0xf   :  { %300 = vmatpush3.bf16.msra.mxu0 %v341_v7  ;;  %320 = vmatpush3.bf16.msra.mxu1 %v342_v8 }
  0x10   :  { %301 = vmatprep.subr.bf16.mxu0 %v351_v0  ;;  %321 = vmatprep.subr.bf16.mxu1 %v351_v0 }
  0x13   :  { %302 = vmatpush3.bf16.msra.mxu0 %v343_v9  ;;  %322 = vmatpush3.bf16.msra.mxu1 %v344_v10 }
  0x14   :  { %303 = vmatprep.subr.bf16.mxu0 %v351_v0  ;;  %323 = vmatprep.subr.bf16.mxu1 %v351_v0 }
  0x17   :  { %304 = vmatpush3.bf16.msra.mxu0 %v345_v11  ;;  %324 = vmatpush3.bf16.msra.mxu1 %v346_v12 }
  0x18   :  { %305 = vmatprep.subr.bf16.mxu0 %v351_v0  ;;  %325 = vmatprep.subr.bf16.mxu1 %v351_v0 }
  0x1b   :  { %306 = vmatpush3.bf16.msra.mxu0 %v347_v13  ;;  %326 = vmatpush3.bf16.msra.mxu1 %v348_v14 }
  0x1c   :  { %307 = vmatprep.subr.bf16.mxu0 %v351_v0  ;;  %327 = vmatprep.subr.bf16.mxu1 %v351_v0 }
  0x1f   :  { %308 = vmatpush3.bf16.msra.mxu0 %v349_v15  ;;  %328 = vmatpush3.bf16.msra.mxu1 %v350_v16 }
  0x22   :  { %310 = vmatmul.mubr.bf16.vlgmr.msra.gmra.mxu0 %v43_v17  ;;  %330 = vmatmul.mubr.bf16.vlgmr.msra.gmra.mxu1 %v26_v18 }
  0xe2   :  { %v142_v19 = vpop.f32.mrf.mxu0  ;;  %v230_v20 = vpop.f32.mrf.mxu1 }
  0xe3   :  { %v231_v22 = vadd.f32 %v230_v20, %v142_v19 }
  0xe4   :  { %v311_v23 = vpop.f32.mrf.mxu0  ;;  %v331_v24 = vpop.f32.mrf.mxu1 }
  0xe5   :  { %v250_v25 = vadd.f32 %v274_v21, %v231_v22 }
  0xe6   :  { %v145_v26 = vpop.f32.mrf.mxu0  ;;  %v233_v27 = vpop.f32.mrf.mxu1 }
  0xe7   :  { %v251_v28 = vmax.f32 %v250_v25, 0.0 }
  0xe8   :  { %v312_v29 = vpop.f32.mrf.mxu0  ;;  %v332_v30 = vpop.f32.mrf.mxu1 }
  0xe9   :  { %v252_v31 = vpack.c.bf16 %v251_v28, %v251_v28 }
  0xeb   :  { %253 = vst [vmem:[%s448_s5] sm:$0xf] %v252_v31 }

// kernel: _lambda_.15
= control target key start
LH: loop header
LB: loop body
LE: loop exit
PB: predicated region body
PF: predicated region fallthrough
CT: control target
= control target key end

     0   :  { %v375_v0 = vmov 0.0   ;;  %vm376_vm0 = vmmov 0   ;;  %s467_s2 = inlined_call_operand.vmem [shape: bf16[128,128], index: 2, kind: input, shape index: {}]   ;;  %s468_s1 = inlined_call_operand.vmem [shape: bf16[128,128], index: 1, kind: input, shape index: {}]   ;;  %s469_s0 = inlined_call_operand.vmem [shape: bf16[8,128], index: 0, kind: input, shape index: {}]   ;;  %s470_s4 = inlined_call_operand.vmem [shape: f32[1,128], index: 4, kind: input, shape index: {}]   ;;  %s471_s3 = inlined_call_operand.vmem [shape: f32[1,128], index: 3, kind: input, shape index: {}]   ;;  %s472_s5 = inlined_call_operand.vmem [shape: bf16[8,128], index: 5, kind: output, shape index: {}]  }
   0x1   :  { %333 = vmatprep.subr.bf16.mxu1 %v375_v0  ;;  %v355_v1 = vld [vmem:[%s467_s2 + $0x38] sm:$0xff]   ;;  %313 = vmatprep.subr.bf16.mxu0 %v375_v0  ;;  %v356_v2 = vld [vmem:[%s467_s2 + $0x30] sm:$0xff]   ;;  %v357_v3 = vld [vmem:[%s467_s2 + $0x28] sm:$0xff]  }
   0x2   :  { %349 = vmatprep.mubr.msk.bf16.mxu1 %vm376_vm0, %v375_v0  ;;  %329 = vmatprep.mubr.msk.bf16.mxu0 %vm376_vm0, %v375_v0  ;;  %v362_v4 = vld [vmem:[%s468_s1 + $0x38] sm:$0xff]   ;;  %v364_v5 = vld [vmem:[%s468_s1 + $0x30] sm:$0xff]   ;;  %v358_v6 = vld [vmem:[%s467_s2 + $0x20] sm:$0xff]  }
   0x3   :  { %334 = vmatpush3.bf16.msra.mxu1 %v355_v1  ;;  %314 = vmatpush3.bf16.msra.mxu0 %v362_v4  ;;  %v365_v7 = vld [vmem:[%s468_s1 + $0x28] sm:$0xff]   ;;  %v359_v8 = vld [vmem:[%s467_s2 + $0x18] sm:$0xff]   ;;  %v366_v9 = vld [vmem:[%s468_s1 + $0x20] sm:$0xff]  }
   0x4   :  { %335 = vmatprep.subr.bf16.mxu1 %v375_v0  ;;  %315 = vmatprep.subr.bf16.mxu0 %v375_v0  ;;  %v360_v10 = vld [vmem:[%s467_s2 + $0x10] sm:$0xff]   ;;  %v367_v11 = vld [vmem:[%s468_s1 + $0x18] sm:$0xff]   ;;  %v361_v12 = vld [vmem:[%s467_s2 + $0x8] sm:$0xff]  }
   0x5   :  { %v368_v13 = vld [vmem:[%s468_s1 + $0x10] sm:$0xff]   ;;  %v363_v14 = vld [vmem:[%s467_s2] sm:$0xff]   ;;  %v369_v15 = vld [vmem:[%s468_s1 + $0x8] sm:$0xff]  }
   0x6   :  { %v27_v16 = vld [vmem:[%s469_s0] sm:$0xf] }
   0x7   :  { %336 = vmatpush3.bf16.msra.mxu1 %v356_v2  ;;  %316 = vmatpush3.bf16.msra.mxu0 %v364_v5  ;;  %v370_v17 = vld [vmem:[%s468_s1] sm:$0xff]  }
   0x8   :  { %337 = vmatprep.subr.bf16.mxu1 %v375_v0  ;;  %317 = vmatprep.subr.bf16.mxu0 %v375_v0  ;;  %v293_v18 = vld [vmem:[%s470_s4] ss:$0 sm:$0xff] }
   0x9   :  { %v292_v31 = vld [vmem:[%s471_s3] ss:$0 sm:$0xff] }
   0xb   :  { %338 = vmatpush3.bf16.msra.mxu1 %v357_v3  ;;  %318 = vmatpush3.bf16.msra.mxu0 %v365_v7 }
   0xc   :  { %339 = vmatprep.subr.bf16.mxu1 %v375_v0  ;;  %319 = vmatprep.subr.bf16.mxu0 %v375_v0 }
   0xf   :  { %340 = vmatpush3.bf16.msra.mxu1 %v358_v6  ;;  %320 = vmatpush3.bf16.msra.mxu0 %v366_v9 }
  0x10   :  { %341 = vmatprep.subr.bf16.mxu1 %v375_v0  ;;  %321 = vmatprep.subr.bf16.mxu0 %v375_v0 }
  0x13   :  { %342 = vmatpush3.bf16.msra.mxu1 %v359_v8  ;;  %322 = vmatpush3.bf16.msra.mxu0 %v367_v11 }
  0x14   :  { %343 = vmatprep.subr.bf16.mxu1 %v375_v0  ;;  %323 = vmatprep.subr.bf16.mxu0 %v375_v0 }
  0x17   :  { %344 = vmatpush3.bf16.msra.mxu1 %v360_v10  ;;  %324 = vmatpush3.bf16.msra.mxu0 %v368_v13 }
  0x18   :  { %345 = vmatprep.subr.bf16.mxu1 %v375_v0  ;;  %325 = vmatprep.subr.bf16.mxu0 %v375_v0 }
  0x1b   :  { %346 = vmatpush3.bf16.msra.mxu1 %v361_v12  ;;  %326 = vmatpush3.bf16.msra.mxu0 %v369_v15 }
  0x1c   :  { %347 = vmatprep.subr.bf16.mxu1 %v375_v0  ;;  %327 = vmatprep.subr.bf16.mxu0 %v375_v0 }
  0x1f   :  { %348 = vmatpush3.bf16.msra.mxu1 %v363_v14  ;;  %328 = vmatpush3.bf16.msra.mxu0 %v370_v17 }
  0x22   :  { %350 = vmatmul.mubr.bf16.vlgmr.msra.gmra.mxu1 %v27_v16  ;;  %330 = vmatmul.mubr.bf16.vlgmr.msra.gmra.mxu0 %v27_v16 }
  0xe2   :  { %v234_v19 = vpop.f32.mrf.mxu1  ;;  %v127_v25 = vpop.f32.mrf.mxu0 }
  0xe3   :  { %v262_v20 = vadd.f32 %v293_v18, %v234_v19  ;;  %v253_v32 = vadd.f32 %v292_v31, %v127_v25 }
  0xe4   :  { %v351_v21 = vpop.f32.mrf.mxu1  ;;  %v331_v26 = vpop.f32.mrf.mxu0 }
  0xe5   :  { %v294_v22 = vmul.f32 -1.442695, %v262_v20 }
  0xe6   :  { %v237_v23 = vpop.f32.mrf.mxu1  ;;  %v130_v27 = vpop.f32.mrf.mxu0 }
  0xe7   :  { %371 = vpow2.f32 %v294_v22 }
  0xe8   :  { %v352_v24 = vpop.f32.mrf.mxu1  ;;  %v332_v28 = vpop.f32.mrf.mxu0 }
  0xf4   :  { %v372_v29 = vpop.eup %371 }
  0xf5   :  { %v266_v30 = vadd.f32 1.0, %v372_v29 }
  0xf7   :  { %373 = vrcp.f32 %v266_v30 }
 0x104   :  { %v374_v33 = vpop.eup %373 }
 0x105   :  { %v269_v34 = vmul.f32 %v374_v33, %v253_v32 }
 0x107   :  { %v270_v35 = vpack.c.bf16 %v269_v34, %v269_v34 }
 0x109   :  { %271 = vst [vmem:[%s472_s5] sm:$0xf] %v270_v35 }

// kernel: tile.13
= control target key start
LH: loop header
LB: loop body
LE: loop exit
PB: predicated region body
PF: predicated region fallthrough
CT: control target
= control target key end

     0   :  { %s22_s0 = inlined_call_operand.vmem [shape: f32[8], index: 0, kind: input, shape index: {}]   ;;  %s23_s1 = inlined_call_operand.vmem [shape: f32[4,8], index: 1, kind: output, shape index: {}]  }
   0x1   :  { %v4_v0 = vld [vmem:[%s22_s0] ss:$0 sm:$0xff] }
   0x2   :  { %5 = vst [vmem:[%s23_s1] sm:$0xf] %v4_v0 }

// kernel: tile.14
= control target key start
LH: loop header
LB: loop body
LE: loop exit
PB: predicated region body
PF: predicated region fallthrough
CT: control target
= control target key end

     0   :  { %vm8_vm0 = vcmask 64512   ;;  %s40_s8 = smov 8   ;;  %s41_s9 = smov 16   ;;  %vm14_vm1 = vcmask 261312   ;;  %vm20_vm2 = vcmask 195712   ;;  %vm26_vm3 = vcmask 130112   ;;  %s58_s0 = inlined_call_operand.vmem [shape: f32[4,8], index: 0, kind: input, shape index: {}]   ;;  %s59_s1 = inlined_call_operand.vmem [shape: f32[1,32], index: 1, kind: output, shape index: {}]  }
   0x1   :  { %v5_v0 = vld [vmem:[%s58_s0] sm:$0xf]  ;;  %s39_s0 = smov 24  }
   0x2   :  { %6 = vst [vmem:[#allocation1] sm:$0xf] %v5_v0 }
   0x9   :  { %v11_v1 = vld [vmem:[#allocation1 + $0x3] sm:$0x1]   ;;  %v23_v2 = vld [vmem:[#allocation1 + $0x1] sm:$0x1]   ;;  %v7_v3 = vld [vmem:[#allocation1] sm:$0x1]  }
   0xa   :  { %12 = vrot.lane.b32.xlu0 %v11_v1, %s39_s0  ;;  %24 = vrot.lane.b32.xlu1 %v23_v2, %s40_s8  ;;  %v17_v4 = vld [vmem:[#allocation1 + $0x2] sm:$0x1]   ;;  %9 = vst.msk [vmem:[#allocation0] sm:$0x1] %vm8_vm0, %v7_v3  }
   0xe   :  { %18 = vrot.lane.b32.xlu0 %v17_v4, %s41_s9 }
  0x7c   :  { %v13_v5 = vpop.permute.xlu0 %12   ;;  %v25_v6 = vpop.permute.xlu1 %24  }
  0x7d   :  { %15 = vst.msk [vmem:[#allocation0] sm:$0x1] %vm14_vm1, %v13_v5  }
  0x80   :  { %v19_v7 = vpop.permute.xlu0 %18  }
  0x81   :  { %21 = vst.msk [vmem:[#allocation0] sm:$0x1] %vm20_vm2, %v19_v7  }
  0x82   :  { %27 = vst.msk [vmem:[#allocation0] sm:$0x1] %vm26_vm3, %v25_v6  }
  0x89   :  { %v32_v8 = vld [vmem:[#allocation0] sm:$0x1] }
  0x8a   :  { %35 = vst [vmem:[%s59_s1] sm:$0x1] %v32_v8 }

// kernel: _lambda_.16
= control target key start
LH: loop header
LB: loop body
LE: loop exit
PB: predicated region body
PF: predicated region fallthrough
CT: control target
= control target key end

     0   :  { %v450_v1 = vmov 0   ;;  %v319_v34 = vlaneseq  ;;  %s579_s1 = inlined_call_operand.vmem [shape: bf16[128,512], index: 1, kind: input, shape index: {}]   ;;  %s580_s0 = inlined_call_operand.vmem [shape: bf16[8,128], index: 0, kind: input, shape index: {}]   ;;  %s581_s2 = inlined_call_operand.vmem [shape: f32[1,512], index: 2, kind: input, shape index: {}]   ;;  %s582_s3 = inlined_call_operand.vmem [shape: bf16[8,512], index: 3, kind: output, shape index: {}]  }
   0x1   :  { %v402_v0 = vld [vmem:[%s579_s1 + $0xe4] ss:$16 sps:$4 sm:$0xff]   ;;  %248 = vmatprep.mubr.bf16.mxu0 %v450_v1  ;;  %289 = vmatprep.mubr.bf16.mxu1 %v450_v1  ;;  %v404_v2 = vld [vmem:[%s579_s1 + $0xec] ss:$16 sps:$4 sm:$0xff]   ;;  %v406_v3 = vld [vmem:[%s579_s1 + $0xe0] ss:$16 sps:$4 sm:$0xff]  }
   0x2   :  { %216 = vmatprep.subr.bf16.mxu0 %v402_v0  ;;  %v407_v4 = vld [vmem:[%s579_s1 + $0xe8] ss:$16 sps:$4 sm:$0xff]   ;;  %257 = vmatprep.subr.bf16.mxu1 %v404_v2  ;;  %v408_v5 = vld [vmem:[%s579_s1 + $0xc4] ss:$16 sps:$4 sm:$0xff]   ;;  %v410_v6 = vld [vmem:[%s579_s1 + $0xcc] ss:$16 sps:$4 sm:$0xff]  }
   0x3   :  { %217 = vmatpush1.bf16.msra.mxu0 %v406_v3  ;;  %258 = vmatpush1.bf16.msra.mxu1 %v407_v4  ;;  %v412_v7 = vld [vmem:[%s579_s1 + $0xc0] ss:$16 sps:$4 sm:$0xff]   ;;  %v413_v8 = vld [vmem:[%s579_s1 + $0xc8] ss:$16 sps:$4 sm:$0xff]   ;;  %v414_v9 = vld [vmem:[%s579_s1 + $0xa4] ss:$16 sps:$4 sm:$0xff]  }
   0x4   :  { %218 = vmatprep.subr.bf16.mxu0 %v408_v5  ;;  %259 = vmatprep.subr.bf16.mxu1 %v410_v6  ;;  %v416_v10 = vld [vmem:[%s579_s1 + $0xac] ss:$16 sps:$4 sm:$0xff]   ;;  %v418_v11 = vld [vmem:[%s579_s1 + $0xa0] ss:$16 sps:$4 sm:$0xff]   ;;  %v419_v12 = vld [vmem:[%s579_s1 + $0xa8] ss:$16 sps:$4 sm:$0xff]  }
   0x5   :  { %v420_v13 = vld [vmem:[%s579_s1 + $0x84] ss:$16 sps:$4 sm:$0xff]   ;;  %v422_v14 = vld [vmem:[%s579_s1 + $0x8c] ss:$16 sps:$4 sm:$0xff]   ;;  %v424_v15 = vld [vmem:[%s579_s1 + $0x80] ss:$16 sps:$4 sm:$0xff]  }
   0x6   :  { %v425_v16 = vld [vmem:[%s579_s1 + $0x88] ss:$16 sps:$4 sm:$0xff]   ;;  %v426_v17 = vld [vmem:[%s579_s1 + $0x64] ss:$16 sps:$4 sm:$0xff]   ;;  %v428_v18 = vld [vmem:[%s579_s1 + $0x6c] ss:$16 sps:$4 sm:$0xff]  }
   0x7   :  { %219 = vmatpush1.bf16.msra.mxu0 %v412_v7  ;;  %260 = vmatpush1.bf16.msra.mxu1 %v413_v8  ;;  %v430_v19 = vld [vmem:[%s579_s1 + $0x60] ss:$16 sps:$4 sm:$0xff]   ;;  %v431_v20 = vld [vmem:[%s579_s1 + $0x68] ss:$16 sps:$4 sm:$0xff]   ;;  %v432_v21 = vld [vmem:[%s579_s1 + $0x44] ss:$16 sps:$4 sm:$0xff]  }
   0x8   :  { %220 = vmatprep.subr.bf16.mxu0 %v414_v9  ;;  %261 = vmatprep.subr.bf16.mxu1 %v416_v10  ;;  %v434_v22 = vld [vmem:[%s579_s1 + $0x4c] ss:$16 sps:$4 sm:$0xff]   ;;  %v436_v23 = vld [vmem:[%s579_s1 + $0x40] ss:$16 sps:$4 sm:$0xff]   ;;  %v437_v24 = vld [vmem:[%s579_s1 + $0x48] ss:$16 sps:$4 sm:$0xff]  }
   0x9   :  { %v438_v25 = vld [vmem:[%s579_s1 + $0x24] ss:$16 sps:$4 sm:$0xff]   ;;  %v440_v26 = vld [vmem:[%s579_s1 + $0x2c] ss:$16 sps:$4 sm:$0xff]   ;;  %v442_v27 = vld [vmem:[%s579_s1 + $0x20] ss:$16 sps:$4 sm:$0xff]  }
   0xa   :  { %v443_v28 = vld [vmem:[%s579_s1 + $0x28] ss:$16 sps:$4 sm:$0xff]   ;;  %v444_v29 = vld [vmem:[%s579_s1 + $0x4] ss:$16 sps:$4 sm:$0xff]   ;;  %v446_v30 = vld [vmem:[%s579_s1 + $0xc] ss:$16 sps:$4 sm:$0xff]  }
   0xb   :  { %221 = vmatpush1.bf16.msra.mxu0 %v418_v11  ;;  %262 = vmatpush1.bf16.msra.mxu1 %v419_v12  ;;  %v448_v31 = vld [vmem:[%s579_s1] ss:$16 sps:$4 sm:$0xff]   ;;  %v449_v32 = vld [vmem:[%s579_s1 + $0x8] ss:$16 sps:$4 sm:$0xff]   ;;  %v320_v35 = vshrl.u32 %v319_v34, 7 }
   0xc   :  { %222 = vmatprep.subr.bf16.mxu0 %v420_v13  ;;  %263 = vmatprep.subr.bf16.mxu1 %v422_v14  ;;  %v23_v33 = vld [vmem:[%s580_s0] sm:$0xf] }
   0xd   :  { %v321_v36 = vsub.s32 0, %v320_v35  ;;  %v329_v37 = vsub.s32 2, %v320_v35  ;;  %v325_v38 = vsub.s32 1, %v320_v35  ;;  %v333_v39 = vsub.s32 3, %v320_v35  ;;  %v317_v40 = vld [vmem:[%s581_s2] sm:$0xf] }
   0xf   :  { %223 = vmatpush1.bf16.msra.mxu0 %v424_v15  ;;  %264 = vmatpush1.bf16.msra.mxu1 %v425_v16  ;;  %v322_v41 = vrot.slane %v317_v40, %v321_v36  ;;  %v330_v42 = vrot.slane %v317_v40, %v329_v37  ;;  %v326_v43 = vrot.slane %v317_v40, %v325_v38 }
  0x10   :  { %224 = vmatprep.subr.bf16.mxu0 %v426_v17  ;;  %265 = vmatprep.subr.bf16.mxu1 %v428_v18  ;;  %v334_v44 = vrot.slane %v317_v40, %v333_v39 }
  0x13   :  { %225 = vmatpush1.bf16.msra.mxu0 %v430_v19  ;;  %266 = vmatpush1.bf16.msra.mxu1 %v431_v20 }
  0x14   :  { %226 = vmatprep.subr.bf16.mxu0 %v432_v21  ;;  %267 = vmatprep.subr.bf16.mxu1 %v434_v22 }
  0x17   :  { %227 = vmatpush1.bf16.msra.mxu0 %v436_v23  ;;  %268 = vmatpush1.bf16.msra.mxu1 %v437_v24 }
  0x18   :  { %228 = vmatprep.subr.bf16.mxu0 %v438_v25  ;;  %269 = vmatprep.subr.bf16.mxu1 %v440_v26 }
  0x1b   :  { %229 = vmatpush1.bf16.msra.mxu0 %v442_v27  ;;  %270 = vmatpush1.bf16.msra.mxu1 %v443_v28 }
  0x1c   :  { %230 = vmatprep.subr.bf16.mxu0 %v444_v29  ;;  %271 = vmatprep.subr.bf16.mxu1 %v446_v30 }
  0x1f   :  { %231 = vmatpush1.bf16.msra.mxu0 %v448_v31  ;;  %272 = vmatpush1.bf16.msra.mxu1 %v449_v32 }
  0x22   :  { %249 = vmatmul.mubr.bf16.vlgmr.msra.gmra.mxu0 %v23_v33  ;;  %290 = vmatmul.mubr.bf16.vlgmr.msra.gmra.mxu1 %v23_v33 }
  0xe2   :  { %v250_v45 = vpop.f32.mrf.mxu0  ;;  %v291_v46 = vpop.f32.mrf.mxu1 }
  0xe3   :  { %v339_v49 = vadd.f32 %v322_v41, %v250_v45  ;;  %v341_v50 = vadd.f32 %v330_v42, %v291_v46 }
  0xe4   :  { %v252_v47 = vpop.f32.mrf.mxu0  ;;  %v293_v48 = vpop.f32.mrf.mxu1 }
  0xe5   :  { %v340_v51 = vadd.f32 %v326_v43, %v252_v47  ;;  %v342_v52 = vadd.f32 %v334_v44, %v293_v48 }
  0xe6   :  { %v254_v53 = vpop.f32.mrf.mxu0  ;;  %v295_v54 = vpop.f32.mrf.mxu1 }
  0xe7   :  { %v399_v55 = vpack.c.bf16 %v340_v51, %v339_v49  ;;  %v400_v56 = vpack.c.bf16 %v342_v52, %v341_v50 }
  0xe8   :  { %v255_v57 = vpop.f32.mrf.mxu0  ;;  %v296_v58 = vpop.f32.mrf.mxu1 }
  0xe9   :  { %359 = vst [vmem:[%s582_s3] sm:$0xff] %v399_v55  ;;  %360 = vst [vmem:[%s582_s3 + $0x8] sm:$0xff] %v400_v56 }

// kernel: _lambda_.20
= control target key start
LH: loop header
LB: loop body
LE: loop exit
PB: predicated region body
PF: predicated region fallthrough
CT: control target
= control target key end

     0   :  { %v380_v0 = vmov 0.0   ;;  %vm381_vm0 = vmmov 0   ;;  %s480_s3 = inlined_call_operand.vmem [shape: bf16[128,128], index: 3, kind: input, shape index: {}]   ;;  %s481_s2 = inlined_call_operand.vmem [shape: bf16[128,128], index: 2, kind: input, shape index: {}]   ;;  %s482_s0 = inlined_call_operand.vmem [shape: bf16[8,128], index: 0, kind: input, shape index: {}]   ;;  %s483_s1 = inlined_call_operand.vmem [shape: bf16[8,128], index: 1, kind: input, shape index: {}]   ;;  %s484_s5 = inlined_call_operand.vmem [shape: f32[1,128], index: 5, kind: input, shape index: {}]   ;;  %s485_s4 = inlined_call_operand.vmem [shape: f32[1,128], index: 4, kind: input, shape index: {}]   ;;  %s486_s6 = inlined_call_operand.vmem [shape: bf16[8,128], index: 6, kind: output, shape index: {}]  }
   0x1   :  { %338 = vmatprep.subr.bf16.mxu1 %v380_v0  ;;  %v360_v1 = vld [vmem:[%s480_s3 + $0x38] sm:$0xff]   ;;  %318 = vmatprep.subr.bf16.mxu0 %v380_v0  ;;  %v361_v2 = vld [vmem:[%s480_s3 + $0x30] sm:$0xff]   ;;  %v362_v3 = vld [vmem:[%s480_s3 + $0x28] sm:$0xff]  }
   0x2   :  { %354 = vmatprep.mubr.msk.bf16.mxu1 %vm381_vm0, %v380_v0  ;;  %334 = vmatprep.mubr.msk.bf16.mxu0 %vm381_vm0, %v380_v0  ;;  %v367_v4 = vld [vmem:[%s481_s2 + $0x38] sm:$0xff]   ;;  %v369_v5 = vld [vmem:[%s481_s2 + $0x30] sm:$0xff]   ;;  %v363_v6 = vld [vmem:[%s480_s3 + $0x20] sm:$0xff]  }
   0x3   :  { %339 = vmatpush3.bf16.msra.mxu1 %v360_v1  ;;  %319 = vmatpush3.bf16.msra.mxu0 %v367_v4  ;;  %v370_v7 = vld [vmem:[%s481_s2 + $0x28] sm:$0xff]   ;;  %v364_v8 = vld [vmem:[%s480_s3 + $0x18] sm:$0xff]   ;;  %v371_v9 = vld [vmem:[%s481_s2 + $0x20] sm:$0xff]  }
   0x4   :  { %340 = vmatprep.subr.bf16.mxu1 %v380_v0  ;;  %320 = vmatprep.subr.bf16.mxu0 %v380_v0  ;;  %v365_v10 = vld [vmem:[%s480_s3 + $0x10] sm:$0xff]   ;;  %v372_v11 = vld [vmem:[%s481_s2 + $0x18] sm:$0xff]   ;;  %v366_v12 = vld [vmem:[%s480_s3 + $0x8] sm:$0xff]  }
   0x5   :  { %v373_v13 = vld [vmem:[%s481_s2 + $0x10] sm:$0xff]   ;;  %v368_v14 = vld [vmem:[%s480_s3] sm:$0xff]   ;;  %v374_v18 = vld [vmem:[%s481_s2 + $0x8] sm:$0xff]  }
   0x6   :  { %v30_v15 = vld [vmem:[%s482_s0] sm:$0xf] }
   0x7   :  { %341 = vmatpush3.bf16.msra.mxu1 %v361_v2  ;;  %321 = vmatpush3.bf16.msra.mxu0 %v369_v5  ;;  %v31_v16 = vld [vmem:[%s483_s1] sm:$0xf] }
   0x8   :  { %342 = vmatprep.subr.bf16.mxu1 %v380_v0  ;;  %322 = vmatprep.subr.bf16.mxu0 %v380_v0  ;;  %v32_v17 = vadd.bf16 %v31_v16, %v30_v15  ;;  %v375_v19 = vld [vmem:[%s481_s2] sm:$0xff]  }
   0x9   :  { %v298_v20 = vld [vmem:[%s484_s5] ss:$0 sm:$0xff] }
   0xa   :  { %v297_v33 = vld [vmem:[%s485_s4] ss:$0 sm:$0xff] }
   0xb   :  { %343 = vmatpush3.bf16.msra.mxu1 %v362_v3  ;;  %323 = vmatpush3.bf16.msra.mxu0 %v370_v7 }
   0xc   :  { %344 = vmatprep.subr.bf16.mxu1 %v380_v0  ;;  %324 = vmatprep.subr.bf16.mxu0 %v380_v0 }
   0xf   :  { %345 = vmatpush3.bf16.msra.mxu1 %v363_v6  ;;  %325 = vmatpush3.bf16.msra.mxu0 %v371_v9 }
  0x10   :  { %346 = vmatprep.subr.bf16.mxu1 %v380_v0  ;;  %326 = vmatprep.subr.bf16.mxu0 %v380_v0 }
  0x13   :  { %347 = vmatpush3.bf16.msra.mxu1 %v364_v8  ;;  %327 = vmatpush3.bf16.msra.mxu0 %v372_v11 }
  0x14   :  { %348 = vmatprep.subr.bf16.mxu1 %v380_v0  ;;  %328 = vmatprep.subr.bf16.mxu0 %v380_v0 }
  0x17   :  { %349 = vmatpush3.bf16.msra.mxu1 %v365_v10  ;;  %329 = vmatpush3.bf16.msra.mxu0 %v373_v13 }
  0x18   :  { %350 = vmatprep.subr.bf16.mxu1 %v380_v0  ;;  %330 = vmatprep.subr.bf16.mxu0 %v380_v0 }
  0x1b   :  { %351 = vmatpush3.bf16.msra.mxu1 %v366_v12  ;;  %331 = vmatpush3.bf16.msra.mxu0 %v374_v18 }
  0x1c   :  { %352 = vmatprep.subr.bf16.mxu1 %v380_v0  ;;  %332 = vmatprep.subr.bf16.mxu0 %v380_v0 }
  0x1f   :  { %353 = vmatpush3.bf16.msra.mxu1 %v368_v14  ;;  %333 = vmatpush3.bf16.msra.mxu0 %v375_v19 }
  0x22   :  { %355 = vmatmul.mubr.bf16.vlgmr.msra.gmra.mxu1 %v32_v17  ;;  %335 = vmatmul.mubr.bf16.vlgmr.msra.gmra.mxu0 %v32_v17 }
  0xe2   :  { %v239_v21 = vpop.f32.mrf.mxu1  ;;  %v132_v27 = vpop.f32.mrf.mxu0 }
  0xe3   :  { %v267_v22 = vadd.f32 %v298_v20, %v239_v21  ;;  %v258_v34 = vadd.f32 %v297_v33, %v132_v27 }
  0xe4   :  { %v356_v23 = vpop.f32.mrf.mxu1  ;;  %v336_v28 = vpop.f32.mrf.mxu0 }
  0xe5   :  { %v299_v24 = vmul.f32 -1.442695, %v267_v22 }
  0xe6   :  { %v242_v25 = vpop.f32.mrf.mxu1  ;;  %v135_v29 = vpop.f32.mrf.mxu0 }
  0xe7   :  { %376 = vpow2.f32 %v299_v24 }
  0xe8   :  { %v357_v26 = vpop.f32.mrf.mxu1  ;;  %v337_v30 = vpop.f32.mrf.mxu0 }
  0xf4   :  { %v377_v31 = vpop.eup %376 }
  0xf5   :  { %v271_v32 = vadd.f32 1.0, %v377_v31 }
  0xf7   :  { %378 = vrcp.f32 %v271_v32 }
 0x104   :  { %v379_v35 = vpop.eup %378 }
 0x105   :  { %v274_v36 = vmul.f32 %v379_v35, %v258_v34 }
 0x107   :  { %v275_v37 = vpack.c.bf16 %v274_v36, %v274_v36 }
 0x109   :  { %276 = vst [vmem:[%s486_s6] sm:$0xf] %v275_v37 }

// kernel: _lambda_.17
= control target key start
LH: loop header
LB: loop body
LE: loop exit
PB: predicated region body
PF: predicated region fallthrough
CT: control target
= control target key end

     0   :  { %v489_v0 = vmov 0.0   ;;  %s671_s17 = smov 0   ;;  %s764_s0 = inlined_call_operand.vmem [shape: bf16[3,2,512], index: 0, kind: input, shape index: {}]   ;;  %s765_s1 = inlined_call_operand.vmem [shape: bf16[128,512], index: 1, kind: input, shape index: {}]   ;;  %s766_s2 = inlined_call_operand.vmem [shape: f32[3,2,128], index: 2, kind: output, shape index: {}]  }
   0x1   :  { %16 = vst [vmem:[#allocation2] sm:$0x3] %v489_v0  ;;  %17 = vst [vmem:[#allocation3] sm:$0x3] %v489_v0  ;;  %v510_v1 = vld [vmem:[%s765_s1] sm:$0xff]  ;;  %v515_v2 = vld [vmem:[%s765_s1 + $0x8] sm:$0xff] }
   0x2   :  { %v520_v3 = vld [vmem:[%s765_s1 + $0x10] sm:$0xff]  ;;  %v525_v4 = vld [vmem:[%s765_s1 + $0x18] sm:$0xff]  ;;  %v530_v5 = vld [vmem:[%s765_s1 + $0x20] sm:$0xff] }
   0x3   :  { %v535_v6 = vld [vmem:[%s765_s1 + $0x28] sm:$0xff]  ;;  %v540_v7 = vld [vmem:[%s765_s1 + $0x30] sm:$0xff]  ;;  %v545_v8 = vld [vmem:[%s765_s1 + $0x38] sm:$0xff] }
   0x4   :  { %v550_v9 = vld [vmem:[%s765_s1 + $0x40] sm:$0xff]  ;;  %v555_v10 = vld [vmem:[%s765_s1 + $0x48] sm:$0xff]  ;;  %v560_v11 = vld [vmem:[%s765_s1 + $0x50] sm:$0xff] }
   0x5   :  { %v565_v12 = vld [vmem:[%s765_s1 + $0x58] sm:$0xff]  ;;  %v570_v13 = vld [vmem:[%s765_s1 + $0x60] sm:$0xff]  ;;  %v575_v14 = vld [vmem:[%s765_s1 + $0x68] sm:$0xff] }
   0x6   :  { %v580_v15 = vld [vmem:[%s765_s1 + $0x70] sm:$0xff]  ;;  %v585_v16 = vld [vmem:[%s765_s1 + $0x78] sm:$0xff]  ;;  %v590_v17 = vld [vmem:[%s765_s1 + $0x80] sm:$0xff] }
   0x7   :  { %v595_v18 = vld [vmem:[%s765_s1 + $0x88] sm:$0xff]  ;;  %v600_v19 = vld [vmem:[%s765_s1 + $0x90] sm:$0xff]  ;;  %v605_v20 = vld [vmem:[%s765_s1 + $0x98] sm:$0xff] }
   0x8   :  { %v610_v21 = vld [vmem:[%s765_s1 + $0xa0] sm:$0xff]  ;;  %v615_v23 = vld [vmem:[%s765_s1 + $0xa8] sm:$0xff]  ;;  %v620_v24 = vld [vmem:[%s765_s1 + $0xb0] sm:$0xff] }
   0x9   :  { %v50_v22 = vld [vmem:[#allocation2] sm:$0x3]   ;;  %v625_v25 = vld [vmem:[%s765_s1 + $0xb8] sm:$0xff]  ;;  %v635_v27 = vld [vmem:[%s765_s1 + $0xc8] sm:$0xff] }
   0xa   :  { %v630_v26 = vld [vmem:[%s765_s1 + $0xc0] sm:$0xff]  ;;  %v640_v28 = vld [vmem:[%s765_s1 + $0xd0] sm:$0xff]  ;;  %v645_v29 = vld [vmem:[%s765_s1 + $0xd8] sm:$0xff] }
   0xb   :  { %v650_v30 = vld [vmem:[%s765_s1 + $0xe0] sm:$0xff]  ;;  %v655_v31 = vld [vmem:[%s765_s1 + $0xe8] sm:$0xff]  ;;  %v660_v32 = vld [vmem:[%s765_s1 + $0xf0] sm:$0xff] }
   0xc   :  { %v665_v33 = vld [vmem:[%s765_s1 + $0xf8] sm:$0xff]  ;;  %v51_v34 = vld [vmem:[#allocation3] sm:$0x3]  }
   0xd LB: > { %v415_v35 = vcombine.high %v650_v30, %v660_v32  ;;  %v417_v36 = vcombine.high %v655_v31, %v665_v33  ;;  %v414_v37 = vcombine.low %v650_v30, %v660_v32  ;;  %v416_v38 = vcombine.low %v655_v31, %v665_v33  ;;  %s385_s1 = sshll.u32 %s487_s17, 2  ;;  %s421_s21 = sshll.u32 %s487_s17, 1  ;;  %s487_s17 = sphi %s671_s17, %s57_s17   ;;  %v483_v22 = vphi %v50_v22, %v768_v22   ;;  %v479_v34 = vphi %v51_v34, %v767_v34  }
   0xe   : > { %v411_v39 = vcombine.high %v630_v26, %v640_v28  ;;  %v413_v40 = vcombine.high %v635_v27, %v645_v29  ;;  %v410_v41 = vcombine.low %v630_v26, %v640_v28  ;;  %v412_v42 = vcombine.low %v635_v27, %v645_v29  ;;  %s61_s20 = scalar_lea.vmem %s764_s0, %s385_s1  ;;  %s362_s24 = scalar_lea.vmem %s766_s2, %s421_s21 }
   0xf   : > { %225 = vmatprep.subr.bf16.mxu0 %v415_v35  ;;  %266 = vmatprep.subr.bf16.mxu1 %v417_v36  ;;  %v407_v43 = vcombine.high %v610_v21, %v620_v24  ;;  %v409_v44 = vcombine.high %v615_v23, %v625_v25  ;;  %v490_v45 = vmov 0   ;;  %v406_v46 = vcombine.low %v610_v21, %v620_v24  ;;  %s57_s17 = sadd.s32 1, %s487_s17  }
  0x10   : > { %226 = vmatpush1.bf16.msra.mxu0 %v414_v37  ;;  %267 = vmatpush1.bf16.msra.mxu1 %v416_v38  ;;  %v408_v47 = vcombine.low %v615_v23, %v625_v25  ;;  %v403_v48 = vcombine.high %v590_v17, %v600_v19  ;;  %v405_v49 = vcombine.high %v595_v18, %v605_v20  ;;  %p54_p0 = scmp.ge.s32.totalorder %s57_s17, 3  }
  0x11   : > { %227 = vmatprep.subr.bf16.mxu0 %v411_v39  ;;  %268 = vmatprep.subr.bf16.mxu1 %v413_v40  ;;  %v402_v50 = vcombine.low %v590_v17, %v600_v19  ;;  %v404_v51 = vcombine.low %v595_v18, %v605_v20  ;;  %v399_v52 = vcombine.high %v570_v13, %v580_v15  ;;  %v491_v39 = vmov 1983009808  }
  0x12   : > { %257 = vmatprep.mubr.bf16.mxu0 %v490_v45  ;;  %298 = vmatprep.mubr.bf16.mxu1 %v490_v45  ;;  %v401_v53 = vcombine.high %v575_v14, %v585_v16  ;;  %v398_v54 = vcombine.low %v570_v13, %v580_v15  ;;  %v400_v55 = vcombine.low %v575_v14, %v585_v16  ;;  %v314_v40 = vunpack.c.l.s4 %v491_v39 }
  0x13   : > { %v395_v56 = vcombine.high %v550_v9, %v560_v11  ;;  %v397_v57 = vcombine.high %v555_v10, %v565_v12  ;;  %v394_v58 = vcombine.low %v550_v9, %v560_v11  ;;  %v396_v59 = vcombine.low %v555_v10, %v565_v12 }
  0x14   : > { %228 = vmatpush1.bf16.msra.mxu0 %v410_v41  ;;  %269 = vmatpush1.bf16.msra.mxu1 %v412_v42  ;;  %v391_v60 = vcombine.high %v530_v5, %v540_v7  ;;  %v393_v61 = vcombine.high %v535_v6, %v545_v8  ;;  %v390_v62 = vcombine.low %v530_v5, %v540_v7  ;;  %v316_v41 = vlaneseq }
  0x15   : > { %229 = vmatprep.subr.bf16.mxu0 %v407_v43  ;;  %270 = vmatprep.subr.bf16.mxu1 %v409_v44  ;;  %v392_v63 = vcombine.low %v535_v6, %v545_v8  ;;  %v387_v0 = vcombine.high %v510_v1, %v520_v3  ;;  %v389_v35 = vcombine.high %v515_v2, %v525_v4  ;;  %v315_v42 = vunpack.c.0.s8 %v314_v40 }
  0x16   : > { %v386_v36 = vcombine.low %v510_v1, %v520_v3  ;;  %v388_v37 = vcombine.low %v515_v2, %v525_v4  ;;  %v64_v38 = vpack.c.bf16 %v483_v22, %v483_v22  ;;  %v317_v43 = vshrl.u32 %v316_v41, 7 }
  0x18   : > { %230 = vmatpush1.bf16.msra.mxu0 %v406_v46  ;;  %271 = vmatpush1.bf16.msra.mxu1 %v408_v47  ;;  %v318_v46 = vsub.s32 %v315_v42, %v317_v43 }
  0x19   : > { %231 = vmatprep.subr.bf16.mxu0 %v403_v48  ;;  %272 = vmatprep.subr.bf16.mxu1 %v405_v49  ;;  %v62_v48 = vld [vmem:[%s61_s20] sm:$0xf] }
  0x1c   : > { %232 = vmatpush1.bf16.msra.mxu0 %v402_v50  ;;  %273 = vmatpush1.bf16.msra.mxu1 %v404_v51 }
  0x1d   : > { %233 = vmatprep.subr.bf16.mxu0 %v399_v52  ;;  %274 = vmatprep.subr.bf16.mxu1 %v401_v53 }
  0x20   : > { %234 = vmatpush1.bf16.msra.mxu0 %v398_v54  ;;  %275 = vmatpush1.bf16.msra.mxu1 %v400_v55  ;;  %v63_v54 = vunpack.c.l.bf16 %v62_v48 }
  0x21   : > { %235 = vmatprep.subr.bf16.mxu0 %v395_v56  ;;  %276 = vmatprep.subr.bf16.mxu1 %v397_v57 }
  0x24   : > { %236 = vmatpush1.bf16.msra.mxu0 %v394_v58  ;;  %277 = vmatpush1.bf16.msra.mxu1 %v396_v59 }
  0x25   : > { %237 = vmatprep.subr.bf16.mxu0 %v391_v60  ;;  %278 = vmatprep.subr.bf16.mxu1 %v393_v61 }
  0x28   : > { %238 = vmatpush1.bf16.msra.mxu0 %v390_v62  ;;  %279 = vmatpush1.bf16.msra.mxu1 %v392_v63 }
  0x29   : > { %239 = vmatprep.subr.bf16.mxu0 %v387_v0  ;;  %280 = vmatprep.subr.bf16.mxu1 %v389_v35 }
  0x2c   : > { %240 = vmatpush1.bf16.msra.mxu0 %v386_v36  ;;  %281 = vmatpush1.bf16.msra.mxu1 %v388_v37 }
  0x2f   : > { %258 = vmatmul.mubr.bf16.vlgmr.msra.gmra.mxu0 %v64_v38  ;;  %299 = vmatmul.mubr.bf16.vlgmr.msra.gmra.mxu1 %v64_v38 }
  0xef   : > { %v259_v44 = vpop.f32.mrf.mxu0  ;;  %v300_v45 = vpop.f32.mrf.mxu1 }
  0xf1   : > { %v261_v47 = vpop.f32.mrf.mxu0  ;;  %v302_v22 = vpop.f32.mrf.mxu1 }
  0xf2   : > { %v311_v49 = vcombine.low %v259_v44, %v261_v47  ;;  %v312_v50 = vcombine.low %v300_v45, %v302_v22 }
  0xf3   : > { %v263_v51 = vpop.f32.mrf.mxu0  ;;  %v304_v52 = vpop.f32.mrf.mxu1 }
  0xf4   : > { %v319_v53 = vrot.slane %v311_v49, %v318_v46  ;;  %v326_v55 = vrot.slane %v312_v50, %v318_v46 }
  0xf5   : > { %v264_v56 = vpop.f32.mrf.mxu0  ;;  %v305_v57 = vpop.f32.mrf.mxu1 }
  0xf6   : > { %v327_v58 = vcombine.low %v319_v53, %v326_v55 }
  0xf8   : > { %v329_v59 = vadd.f32 %v327_v58, %v63_v54 }
  0xfa   : > { %v418_v60 = vmul.f32 -1.442695, %v329_v59  ;;  %v337_v61 = vrot.slane %v329_v59, 2  ;;  %v348_v63 = vrot.slane %v329_v59, 6  ;;  %v345_v36 = vrot.slane %v329_v59, 4 }
  0xfc   : > { %449 = vpow2.f32 %v418_v60  ;;  %v419_v62 = vmul.f32 -1.442695, %v337_v61  ;;  %v420_v0 = vmul.f32 -1.442695, %v348_v63 }
  0xfe   : > { %451 = vpow2.f32 %v419_v62 }
  0xff   : > { %453 = vpow2.f32 %v420_v0 }
 0x109   : > { %v450_v35 = vpop.eup %449 }
 0x10a   : > { %v333_v37 = vadd.f32 1.0, %v450_v35 }
 0x10b   : > { %v452_v38 = vpop.eup %451 }
 0x10c   : > { %455 = vrcp.f32 %v333_v37  ;;  %v342_v39 = vadd.f32 1.0, %v452_v38  ;;  %v454_v40 = vpop.eup %453 }
 0x10d   : > { %457 = vtanh.f32 %v345_v36  ;;  %v353_v44 = vadd.f32 1.0, %v454_v40 }
 0x10e   : > { %459 = vrcp.f32 %v342_v39 }
 0x10f   : > { %461 = vrcp.f32 %v353_v44 }
 0x119   : > { %v456_v41 = vpop.eup %455 }
 0x11a   : > { %v458_v42 = vpop.eup %457 }
 0x11b   : > { %v460_v43 = vpop.eup %459  ;;  %v357_v46 = vmul.f32 %v458_v42, %v456_v41 }
 0x11c   : > { %v356_v45 = vmul.f32 %v479_v34, %v460_v43  ;;  %v462_v48 = vpop.eup %461 }
 0x11e   : > { %v358_v47 = vadd.f32 %v357_v46, %v356_v45  }
 0x120   : > { %463 = vtanh.f32 %v358_v47  ;;  %v767_v34 = vmov %v358_v47  ;;  %365 = vst [vmem:[#allocation3] sm:$0x3] (%p54_p0), %v358_v47 }
 0x12c   :  { %56 = sbr.rel (!%p54_p0) target bundleno = 13 (0xd), region = 41 }
 0x12d   : > { %v464_v22 = vpop.eup %463 }
 0x12e   : > { %v360_v49 = vmul.f32 %v464_v22, %v462_v48  }
 0x130   : > { %363 = vst [vmem:[%s362_s24] sm:$0x3] %v360_v49  ;;  %v768_v22 = vmov %v360_v49  ;;  %364 = vst [vmem:[#allocation2] sm:$0x3] (%p54_p0), %v360_v49 }

// kernel: _lambda_.22
= control target key start
LH: loop header
LB: loop body
LE: loop exit
PB: predicated region body
PF: predicated region fallthrough
CT: control target
= control target key end

     0   :  { %s649_s3 = inlined_call_operand.vmem [shape: bf16[128,128], index: 3, kind: input, shape index: {}]   ;;  %s650_s2 = inlined_call_operand.vmem [shape: bf16[128,128], index: 2, kind: input, shape index: {}]   ;;  %s651_s0 = inlined_call_operand.vmem [shape: bf16[32,128], index: 0, kind: input, shape index: {}]   ;;  %s652_s1 = inlined_call_operand.vmem [shape: bf16[32,128], index: 1, kind: input, shape index: {}]   ;;  %s653_s5 = inlined_call_operand.vmem [shape: f32[1,128], index: 5, kind: input, shape index: {}]   ;;  %s654_s4 = inlined_call_operand.vmem [shape: f32[1,128], index: 4, kind: input, shape index: {}]   ;;  %s655_s6 = inlined_call_operand.vmem [shape: bf16[32,128], index: 6, kind: output, shape index: {}]  }
   0x1   :  { %v498_v0 = vld [vmem:[%s649_s3 + $0x38] sm:$0xff]   ;;  %v499_v1 = vld [vmem:[%s649_s3 + $0x30] sm:$0xff]   ;;  %v500_v2 = vld [vmem:[%s649_s3 + $0x28] sm:$0xff]  }
   0x2   :  { %478 = vmatprep.subr.bf16.mxu1 %v498_v0  ;;  %v505_v3 = vld [vmem:[%s650_s2 + $0x38] sm:$0xff]   ;;  %v501_v4 = vld [vmem:[%s649_s3 + $0x20] sm:$0xff]   ;;  %v507_v5 = vld [vmem:[%s650_s2 + $0x30] sm:$0xff]  }
   0x3   :  { %479 = vmatpush3.bf16.msra.mxu1 %v498_v0  ;;  %458 = vmatprep.subr.bf16.mxu0 %v505_v3  ;;  %v36_v6 = vld [vmem:[%s651_s0] sm:$0xf]  ;;  %v37_v7 = vld [vmem:[%s651_s0 + $0x4] sm:$0xf]  ;;  %v502_v11 = vld [vmem:[%s649_s3 + $0x18] sm:$0xff]  }
   0x4   :  { %480 = vmatprep.subr.bf16.mxu1 %v499_v1  ;;  %459 = vmatpush3.bf16.msra.mxu0 %v505_v3  ;;  %v40_v8 = vld [vmem:[%s652_s1] sm:$0xf]  ;;  %v41_v9 = vld [vmem:[%s652_s1 + $0x4] sm:$0xf]  ;;  %v508_v13 = vld [vmem:[%s650_s2 + $0x28] sm:$0xff]  }
   0x5   :  { %460 = vmatprep.subr.bf16.mxu0 %v507_v5  ;;  %v44_v10 = vadd.bf16 %v40_v8, %v36_v6  ;;  %v45_v12 = vadd.bf16 %v41_v9, %v37_v7  ;;  %v509_v15 = vld [vmem:[%s650_s2 + $0x20] sm:$0xff]   ;;  %v503_v16 = vld [vmem:[%s649_s3 + $0x10] sm:$0xff]   ;;  %v510_v17 = vld [vmem:[%s650_s2 + $0x18] sm:$0xff]  }
   0x6   :  { %v504_v18 = vld [vmem:[%s649_s3 + $0x8] sm:$0xff]   ;;  %v511_v23 = vld [vmem:[%s650_s2 + $0x10] sm:$0xff]   ;;  %v506_v24 = vld [vmem:[%s649_s3] sm:$0xff]  }
   0x7   :  { %481 = vmatpush3.bf16.msra.mxu1 %v499_v1  ;;  %v395_v14 = vcombine.low %v44_v10, %v45_v12  ;;  %v38_v19 = vld [vmem:[%s651_s0 + $0x8] sm:$0xf]  ;;  %v39_v20 = vld [vmem:[%s651_s0 + $0xc] sm:$0xf]  ;;  %v513_v29 = vld [vmem:[%s650_s2] sm:$0xff]  }
   0x8   :  { %482 = vmatprep.subr.bf16.mxu1 %v500_v2  ;;  %461 = vmatpush3.bf16.msra.mxu0 %v507_v5  ;;  %v42_v21 = vld [vmem:[%s652_s1 + $0x8] sm:$0xf]  ;;  %v43_v22 = vld [vmem:[%s652_s1 + $0xc] sm:$0xf]  ;;  %v414_v30 = vld [vmem:[%s653_s5] ss:$0 sm:$0xff] }
   0x9   :  { %462 = vmatprep.subr.bf16.mxu0 %v508_v13  ;;  %494 = vmatprep.mubr.bf16.mxu1 %v395_v14  ;;  %v46_v25 = vadd.bf16 %v42_v21, %v38_v19  ;;  %v47_v26 = vadd.bf16 %v43_v22, %v39_v20  ;;  %v512_v27 = vld [vmem:[%s650_s2 + $0x8] sm:$0xff]   ;;  %v413_v53 = vld [vmem:[%s654_s4] ss:$0 sm:$0xff] }
   0xa   :  { %474 = vmatprep.mubr.bf16.mxu0 %v395_v14 }
   0xb   :  { %483 = vmatpush3.bf16.msra.mxu1 %v500_v2  ;;  %v396_v28 = vcombine.low %v46_v25, %v47_v26 }
   0xc   :  { %484 = vmatprep.subr.bf16.mxu1 %v501_v4  ;;  %463 = vmatpush3.bf16.msra.mxu0 %v508_v13 }
   0xd   :  { %464 = vmatprep.subr.bf16.mxu0 %v509_v15 }
   0xf   :  { %485 = vmatpush3.bf16.msra.mxu1 %v501_v4 }
  0x10   :  { %486 = vmatprep.subr.bf16.mxu1 %v502_v11  ;;  %465 = vmatpush3.bf16.msra.mxu0 %v509_v15 }
  0x11   :  { %466 = vmatprep.subr.bf16.mxu0 %v510_v17 }
  0x13   :  { %487 = vmatpush3.bf16.msra.mxu1 %v502_v11 }
  0x14   :  { %488 = vmatprep.subr.bf16.mxu1 %v503_v16  ;;  %467 = vmatpush3.bf16.msra.mxu0 %v510_v17 }
  0x15   :  { %468 = vmatprep.subr.bf16.mxu0 %v511_v23 }
  0x17   :  { %489 = vmatpush3.bf16.msra.mxu1 %v503_v16 }
  0x18   :  { %490 = vmatprep.subr.bf16.mxu1 %v504_v18  ;;  %469 = vmatpush3.bf16.msra.mxu0 %v511_v23 }
  0x19   :  { %470 = vmatprep.subr.bf16.mxu0 %v512_v27 }
  0x1b   :  { %491 = vmatpush3.bf16.msra.mxu1 %v504_v18 }
  0x1c   :  { %492 = vmatprep.subr.bf16.mxu1 %v506_v24  ;;  %471 = vmatpush3.bf16.msra.mxu0 %v512_v27 }
  0x1d   :  { %472 = vmatprep.subr.bf16.mxu0 %v513_v29 }
  0x1f   :  { %493 = vmatpush3.bf16.msra.mxu1 %v506_v24 }
  0x20   :  { %473 = vmatpush3.bf16.msra.mxu0 %v513_v29 }
  0x22   :  { %495 = vmatmul.mubr.bf16.vlgmr.msra.gmra.mxu1 %v396_v28 }
  0x23   :  { %475 = vmatmul.mubr.bf16.vlgmr.msra.gmra.mxu0 %v396_v28 }
  0xe2   :  { %v496_v31 = vpop.f32.mrf.mxu1 }
  0xe3   :  { %v341_v32 = vadd.f32 %v496_v31, %v414_v30  ;;  %v476_v50 = vpop.f32.mrf.mxu0 }
  0xe4   :  { %v287_v33 = vpop.f32.mrf.mxu1  ;;  %v326_v55 = vadd.f32 %v476_v50, %v413_v53 }
  0xe5   :  { %v417_v34 = vmul.f32 -1.442695, %v341_v32  ;;  %v339_v35 = vadd.f32 %v414_v30, %v287_v33  ;;  %v162_v52 = vpop.f32.mrf.mxu0 }
  0xe6   :  { %v497_v36 = vpop.f32.mrf.mxu1  ;;  %v324_v62 = vadd.f32 %v413_v53, %v162_v52 }
  0xe7   :  { %514 = vpow2.f32 %v417_v34  ;;  %v415_v37 = vmul.f32 -1.442695, %v339_v35  ;;  %v342_v38 = vadd.f32 %v497_v36, %v414_v30  ;;  %v477_v54 = vpop.f32.mrf.mxu0 }
  0xe8   :  { %v290_v39 = vpop.f32.mrf.mxu1  ;;  %v327_v59 = vadd.f32 %v477_v54, %v413_v53 }
  0xe9   :  { %516 = vpow2.f32 %v415_v37  ;;  %v418_v40 = vmul.f32 -1.442695, %v342_v38  ;;  %v340_v41 = vadd.f32 %v414_v30, %v290_v39  ;;  %v165_v57 = vpop.f32.mrf.mxu0 }
  0xea   :  { %v325_v0 = vadd.f32 %v413_v53, %v165_v57 }
  0xeb   :  { %518 = vpow2.f32 %v418_v40  ;;  %v416_v42 = vmul.f32 -1.442695, %v340_v41 }
  0xed   :  { %520 = vpow2.f32 %v416_v42 }
  0xf4   :  { %v515_v43 = vpop.eup %514 }
  0xf5   :  { %v357_v44 = vadd.f32 1.0, %v515_v43 }
  0xf6   :  { %v517_v45 = vpop.eup %516 }
  0xf7   :  { %v355_v46 = vadd.f32 1.0, %v517_v45  ;;  %522 = vrcp.f32 %v357_v44 }
  0xf8   :  { %v519_v47 = vpop.eup %518 }
  0xf9   :  { %v358_v48 = vadd.f32 1.0, %v519_v47  ;;  %524 = vrcp.f32 %v355_v46 }
  0xfa   :  { %v521_v49 = vpop.eup %520 }
  0xfb   :  { %526 = vrcp.f32 %v358_v48  ;;  %v356_v51 = vadd.f32 1.0, %v521_v49 }
  0xfd   :  { %528 = vrcp.f32 %v356_v51 }
 0x104   :  { %v523_v56 = vpop.eup %522 }
 0x105   :  { %v369_v61 = vmul.f32 %v523_v56, %v326_v55 }
 0x106   :  { %v525_v58 = vpop.eup %524 }
 0x107   :  { %v367_v2 = vmul.f32 %v525_v58, %v324_v62 }
 0x108   :  { %v527_v60 = vpop.eup %526 }
 0x109   :  { %v370_v63 = vmul.f32 %v527_v60, %v327_v59 }
 0x10a   :  { %v529_v1 = vpop.eup %528 }
 0x10b   :  { %v435_v3 = vpack.c.bf16 %v370_v63, %v369_v61  ;;  %v368_v4 = vmul.f32 %v529_v1, %v325_v0 }
 0x10d   :  { %437 = vst [vmem:[%s655_s6 + $0x8] sm:$0xff] %v435_v3   ;;  %v430_v5 = vpack.c.bf16 %v368_v4, %v367_v2 }
 0x10f   :  { %431 = vst [vmem:[%s655_s6] sm:$0xff] %v430_v5  }

// kernel: _lambda_.23
= control target key start
LH: loop header
LB: loop body
LE: loop exit
PB: predicated region body
PF: predicated region fallthrough
CT: control target
= control target key end

     0   :  { %v481_v0 = vmov 0.0   ;;  %vm482_vm0 = vmmov 0   ;;  %s625_s3 = inlined_call_operand.vmem [shape: bf16[128,128], index: 3, kind: input, shape index: {}]   ;;  %s626_s2 = inlined_call_operand.vmem [shape: bf16[128,128], index: 2, kind: input, shape index: {}]   ;;  %s627_s1 = inlined_call_operand.vmem [shape: bf16[40,128], index: 1, kind: input, shape index: {}]   ;;  %s628_s0 = inlined_call_operand.vmem [shape: bf16[40,128], index: 0, kind: input, shape index: {}]   ;;  %s629_s4 = inlined_call_operand.vmem [shape: f32[1,128], index: 4, kind: input, shape index: {}]   ;;  %s630_s5 = inlined_call_operand.vmem [shape: f32[40,128], index: 5, kind: output, shape index: {}]  }
   0x1   :  { %401 = vmatprep.subr.bf16.mxu0 %v481_v0  ;;  %429 = vmatprep.subr.bf16.mxu1 %v481_v0  ;;  %v459_v1 = vld [vmem:[%s625_s3 + $0x38] sm:$0xff]   ;;  %v461_v3 = vld [vmem:[%s625_s3 + $0x30] sm:$0xff]   ;;  %v463_v5 = vld [vmem:[%s625_s3 + $0x28] sm:$0xff]  }
   0x2   :  { %v460_v2 = vld [vmem:[%s626_s2 + $0x38] sm:$0xff]   ;;  %417 = vmatprep.mubr.msk.bf16.mxu0 %vm482_vm0, %v481_v0  ;;  %445 = vmatprep.mubr.msk.bf16.mxu1 %vm482_vm0, %v481_v0  ;;  %v462_v4 = vld [vmem:[%s626_s2 + $0x30] sm:$0xff]   ;;  %v464_v6 = vld [vmem:[%s626_s2 + $0x28] sm:$0xff]  }
   0x3   :  { %402 = vmatpush3.bf16.msra.mxu0 %v459_v1  ;;  %430 = vmatpush3.bf16.msra.mxu1 %v460_v2  ;;  %v465_v7 = vld [vmem:[%s625_s3 + $0x20] sm:$0xff]   ;;  %v467_v9 = vld [vmem:[%s625_s3 + $0x18] sm:$0xff]   ;;  %v469_v11 = vld [vmem:[%s625_s3 + $0x10] sm:$0xff]  }
   0x4   :  { %403 = vmatprep.subr.bf16.mxu0 %v481_v0  ;;  %431 = vmatprep.subr.bf16.mxu1 %v481_v0  ;;  %v466_v8 = vld [vmem:[%s626_s2 + $0x20] sm:$0xff]   ;;  %v468_v10 = vld [vmem:[%s626_s2 + $0x18] sm:$0xff]   ;;  %v470_v12 = vld [vmem:[%s626_s2 + $0x10] sm:$0xff]  }
   0x5   :  { %v471_v13 = vld [vmem:[%s625_s3 + $0x8] sm:$0xff]   ;;  %v473_v15 = vld [vmem:[%s625_s3] sm:$0xff]   ;;  %v479_v21 = vld [vmem:[%s627_s1 + $0x10] ss:$0 sps:$4 sm:$0xff]  }
   0x6   :  { %v472_v14 = vld [vmem:[%s626_s2 + $0x8] sm:$0xff]   ;;  %v474_v16 = vld [vmem:[%s626_s2] sm:$0xff]   ;;  %v480_v22 = vld [vmem:[%s628_s0 + $0x10] ss:$0 sps:$4 sm:$0xff]  }
   0x7   :  { %404 = vmatpush3.bf16.msra.mxu0 %v461_v3  ;;  %432 = vmatpush3.bf16.msra.mxu1 %v462_v4  ;;  %v475_v17 = vld [vmem:[%s627_s1] sm:$0xff]   ;;  %v477_v19 = vld [vmem:[%s627_s1 + $0x8] sm:$0xff]  }
   0x8   :  { %405 = vmatprep.subr.bf16.mxu0 %v481_v0  ;;  %433 = vmatprep.subr.bf16.mxu1 %v481_v0  ;;  %v476_v18 = vld [vmem:[%s628_s0] sm:$0xff]   ;;  %v478_v20 = vld [vmem:[%s628_s0 + $0x8] sm:$0xff]  }
   0x9   :  { %v378_v25 = vld [vmem:[%s629_s4] ss:$0 sm:$0xff] }
   0xb   :  { %406 = vmatpush3.bf16.msra.mxu0 %v463_v5  ;;  %434 = vmatpush3.bf16.msra.mxu1 %v464_v6 }
   0xc   :  { %407 = vmatprep.subr.bf16.mxu0 %v481_v0  ;;  %435 = vmatprep.subr.bf16.mxu1 %v481_v0 }
   0xf   :  { %408 = vmatpush3.bf16.msra.mxu0 %v465_v7  ;;  %436 = vmatpush3.bf16.msra.mxu1 %v466_v8 }
  0x10   :  { %409 = vmatprep.subr.bf16.mxu0 %v481_v0  ;;  %437 = vmatprep.subr.bf16.mxu1 %v481_v0 }
  0x13   :  { %410 = vmatpush3.bf16.msra.mxu0 %v467_v9  ;;  %438 = vmatpush3.bf16.msra.mxu1 %v468_v10 }
  0x14   :  { %411 = vmatprep.subr.bf16.mxu0 %v481_v0  ;;  %439 = vmatprep.subr.bf16.mxu1 %v481_v0 }
  0x17   :  { %412 = vmatpush3.bf16.msra.mxu0 %v469_v11  ;;  %440 = vmatpush3.bf16.msra.mxu1 %v470_v12 }
  0x18   :  { %413 = vmatprep.subr.bf16.mxu0 %v481_v0  ;;  %441 = vmatprep.subr.bf16.mxu1 %v481_v0 }
  0x1b   :  { %414 = vmatpush3.bf16.msra.mxu0 %v471_v13  ;;  %442 = vmatpush3.bf16.msra.mxu1 %v472_v14 }
  0x1c   :  { %415 = vmatprep.subr.bf16.mxu0 %v481_v0  ;;  %443 = vmatprep.subr.bf16.mxu1 %v481_v0 }
  0x1f   :  { %416 = vmatpush3.bf16.msra.mxu0 %v473_v15  ;;  %444 = vmatpush3.bf16.msra.mxu1 %v474_v16 }
  0x22   :  { %418 = vmatmul.mubr.bf16.vlgmr.msra.gmra.mxu0 %v475_v17  ;;  %446 = vmatmul.mubr.bf16.vlgmr.msra.gmra.mxu1 %v476_v18 }
  0x23   :  { %421 = vmatprep.mubr.msk.bf16.mxu0 %vm482_vm0, %v481_v0  ;;  %449 = vmatprep.mubr.msk.bf16.mxu1 %vm482_vm0, %v481_v0 }
  0x2a   :  { %422 = vmatmul.mubr.bf16.gmra.mxu0 %v477_v19  ;;  %450 = vmatmul.mubr.bf16.gmra.mxu1 %v478_v20 }
  0x2b   :  { %425 = vmatprep.mubr.msk.bf16.mxu0 %vm482_vm0, %v481_v0  ;;  %453 = vmatprep.mubr.msk.bf16.mxu1 %vm482_vm0, %v481_v0 }
  0x32   :  { %426 = vmatmul.mubr.bf16.gmra.mxu0 %v479_v21  ;;  %454 = vmatmul.mubr.bf16.gmra.mxu1 %v480_v22 }
  0xe2   :  { %v170_v23 = vpop.f32.mrf.mxu0  ;;  %v290_v24 = vpop.f32.mrf.mxu1 }
  0xe3   :  { %v291_v26 = vadd.f32 %v290_v24, %v170_v23 }
  0xe4   :  { %v419_v27 = vpop.f32.mrf.mxu0  ;;  %v447_v28 = vpop.f32.mrf.mxu1 }
  0xe5   :  { %v342_v29 = vadd.f32 %v378_v25, %v291_v26 }
  0xe6   :  { %v173_v30 = vpop.f32.mrf.mxu0  ;;  %v293_v31 = vpop.f32.mrf.mxu1 }
  0xe7   :  { %347 = vst [vmem:[%s630_s5] sm:$0xff] %v342_v29  ;;  %v294_v32 = vadd.f32 %v293_v31, %v173_v30 }
  0xe8   :  { %v420_v33 = vpop.f32.mrf.mxu0  ;;  %v448_v34 = vpop.f32.mrf.mxu1 }
  0xe9   :  { %v343_v35 = vadd.f32 %v378_v25, %v294_v32 }
  0xea   :  { %v178_v36 = vpop.f32.mrf.mxu0  ;;  %v298_v37 = vpop.f32.mrf.mxu1 }
  0xeb   :  { %348 = vst [vmem:[%s630_s5 + $0x8] sm:$0xff] %v343_v35  ;;  %v299_v38 = vadd.f32 %v298_v37, %v178_v36 }
  0xec   :  { %v423_v39 = vpop.f32.mrf.mxu0  ;;  %v451_v40 = vpop.f32.mrf.mxu1 }
  0xed   :  { %v344_v41 = vadd.f32 %v378_v25, %v299_v38 }
  0xee   :  { %v181_v42 = vpop.f32.mrf.mxu0  ;;  %v301_v43 = vpop.f32.mrf.mxu1 }
  0xef   :  { %349 = vst [vmem:[%s630_s5 + $0x10] sm:$0xff] %v344_v41  ;;  %v302_v44 = vadd.f32 %v301_v43, %v181_v42 }
  0xf0   :  { %v424_v45 = vpop.f32.mrf.mxu0  ;;  %v452_v46 = vpop.f32.mrf.mxu1 }
  0xf1   :  { %v345_v47 = vadd.f32 %v378_v25, %v302_v44 }
  0xf2   :  { %v186_v48 = vpop.f32.mrf.mxu0  ;;  %v306_v49 = vpop.f32.mrf.mxu1 }
  0xf3   :  { %350 = vst [vmem:[%s630_s5 + $0x18] sm:$0xff] %v345_v47  ;;  %v307_v50 = vadd.f32 %v306_v49, %v186_v48 }
  0xf4   :  { %v427_v51 = vpop.f32.mrf.mxu0  ;;  %v455_v52 = vpop.f32.mrf.mxu1 }
  0xf5   :  { %v346_v53 = vadd.f32 %v378_v25, %v307_v50 }
  0xf6   :  { %v189_v54 = vpop.f32.mrf.mxu0  ;;  %v309_v55 = vpop.f32.mrf.mxu1 }
  0xf7   :  { %351 = vst [vmem:[%s630_s5 + $0x20] sm:$0xff] %v346_v53 }
  0xf8   :  { %v428_v56 = vpop.f32.mrf.mxu0  ;;  %v456_v57 = vpop.f32.mrf.mxu1 }

</bundles_post_ra>
